<compile_context>
chip_gen: v6e
topology: v6e:2x2x1
jax: 0.10.0
libtpu: 0.0.40
codegen_flags: <defaults>
</compile_context>

<pallas_src>
import functools
import math

import jax
import jax.numpy as jnp
from jax.experimental import pallas as pl
from jax.experimental.pallas import tpu as pltpu


# ---------------------------------------------------------------------------
# helpers
# ---------------------------------------------------------------------------
def _round_up(x, mult):
    return ((x + mult - 1) // mult) * mult


# ---------------------------------------------------------------------------
# Pallas kernels
# ---------------------------------------------------------------------------
def _interp_kernel(unk_ref, knw_ref, kf_ref, out_ref):
    """3-NN inverse-distance interpolation for one (batch, point-tile), channels-first.

    unk_ref : (1, 3, tu)      target xyz (points in lanes)
    knw_ref : (1, m_pad, 3)   source xyz (padded rows = large-coordinate sentinel)
    kf_ref  : (1, C2, m_pad)  source features, bf16, channels-first (padded cols = 0)
    out_ref : (1, C2, tu)     interpolated features, bf16, channels-first
    """
    u = unk_ref[0]                      # (3, tu)   f32
    k = knw_ref[0]                      # (m, 3)    f32
    m = k.shape[0]
    tu = u.shape[1]

    # squared distances (m, tu) -- pure VPU, no shallow K=3 matmul
    d2 = jnp.zeros((m, tu), jnp.float32)
    for c in range(3):
        diff = k[:, c:c + 1] - u[c:c + 1, :]            # (m,1) - (1,tu) -> (m,tu)
        d2 = d2 + diff * diff

    rows = jax.lax.broadcasted_iota(jnp.int32, (m, tu), 0)   # int32, never cast to f32

    wmat = jnp.zeros((m, tu), jnp.float32)              # sparse 3-NN weight matrix
    norm = jnp.zeros((1, tu), jnp.float32)
    dcur = d2
    for _ in range(3):                                  # 3 nearest neighbors
        dmin = jnp.min(dcur, axis=0, keepdims=True)                          # (1, tu)
        sel = jnp.min(jnp.where(dcur == dmin, rows, m), axis=0, keepdims=True)
        onehot = (rows == sel).astype(jnp.float32)                           # one 1 per column
        recip = 1.0 / (jnp.sqrt(dmin) + 1e-8)                                # pointops: sqrt(d2)
        wmat = wmat + onehot * recip
        norm = norm + recip
        dcur = dcur + onehot * jnp.float32(1e30)        # invalidate selected (reuse onehot)

    wmat = (wmat * (1.0 / norm)).astype(jnp.bfloat16)
    out_ref[0] = jnp.dot(kf_ref[0], wmat,
                         preferred_element_type=jnp.float32).astype(out_ref.dtype)


def _mlp_first_kernel(xi_ref, xs_ref, wi_ref, ws_ref, y_ref, sum_ref, sq_ref, *,
                      n_valid, tm, tiles_per_chunk, has_pad):
    """First SharedMLP layer with the channel concat fused away:
         y = W[:C2]^T @ interp_tile + W[C2:]^T @ skip_tile   (bf16 MXU, f32 accumulate)
    BN batch statistics are accumulated in the epilogue; padded point columns are zeroed
    so the statistics stay exact."""
    c = pl.program_id(1)
    i = pl.program_id(2)

    y = jnp.dot(wi_ref[...], xi_ref[0], preferred_element_type=jnp.float32)
    y = y + jnp.dot(ws_ref[...], xs_ref[0], preferred_element_type=jnp.float32)

    if has_pad:                                          # static: emitted only if padding exists
        tile_idx = c * tiles_per_chunk + i
        col = tile_idx * tm + jax.lax.broadcasted_iota(jnp.int32, (1, tm), 1)
        y = jnp.where(col < n_valid, y, 0.0)

    y_ref[0] = y.astype(y_ref.dtype)

    @pl.when(i == 0)
    def _():
        sum_ref[...] = jnp.zeros_like(sum_ref)
        sq_ref[...] = jnp.zeros_like(sq_ref)

    sum_ref[0] += jnp.sum(y, axis=1, keepdims=True)
    sq_ref[0] += jnp.sum(y * y, axis=1, keepdims=True)


def _mlp_mid_kernel(x_ref, w_ref, pscale_ref, pshift_ref, y_ref, sum_ref, sq_ref, *,
                    n_valid, tm, tiles_per_chunk, has_pad):
    """Inner SharedMLP layer: the previous layer's BN affine + ReLU is fused into the prologue
    (the activation crosses HBM once, as raw pre-BN bf16), one MXU dot, then padded-column
    masking + BN statistics fused into the epilogue."""
    c = pl.program_id(1)
    i = pl.program_id(2)

    x = x_ref[0].astype(jnp.float32)                                  # (Cin, tm)
    z = jnp.maximum(x * pscale_ref[...] + pshift_ref[...], 0.0).astype(jnp.bfloat16)
    y = jnp.dot(w_ref[...], z, preferred_element_type=jnp.float32)    # (Cout, tm)

    if has_pad:
        tile_idx = c * tiles_per_chunk + i
        col = tile_idx * tm + jax.lax.broadcasted_iota(jnp.int32, (1, tm), 1)
        y = jnp.where(col < n_valid, y, 0.0)

    y_ref[0] = y.astype(y_ref.dtype)

    @pl.when(i == 0)
    def _():
        sum_ref[...] = jnp.zeros_like(sum_ref)
        sq_ref[...] = jnp.zeros_like(sq_ref)

    sum_ref[0] += jnp.sum(y, axis=1, keepdims=True)
    sq_ref[0] += jnp.sum(y * y, axis=1, keepdims=True)


def _bn_relu_kernel(y_ref, scale_ref, shift_ref, o_ref):
    """Standalone fused affine BN (precomputed scale/shift) + ReLU (last layer only)."""
    y = y_ref[0].astype(jnp.float32)
    o_ref[0] = jnp.maximum(y * scale_ref[...] + shift_ref[...], 0.0)


# ---------------------------------------------------------------------------
# Pallas wrappers
# ---------------------------------------------------------------------------
def _call_matmul_stats(kernel, operands, in_specs, *, b, num_chunks, tiles_per_chunk,
                       tm, cout, n_pad):
    g = b * num_chunks
    return pl.pallas_call(
        kernel,
        out_shape=(
            jax.ShapeDtypeStruct((b, cout, n_pad), jnp.bfloat16),   # pre-BN activations
            jax.ShapeDtypeStruct((g, cout, 1), jnp.float32),        # per-(batch,chunk) sum
            jax.ShapeDtypeStruct((g, cout, 1), jnp.float32),        # per-(batch,chunk) sum sq
        ),
        grid_spec=pltpu.PrefetchScalarGridSpec(
            num_scalar_prefetch=0,
            grid=(b, num_chunks, tiles_per_chunk),
            in_specs=in_specs,
            out_specs=[
                pl.BlockSpec((1, cout, tm),
                             lambda bi, ci, i: (bi, 0, ci * tiles_per_chunk + i)),
                pl.BlockSpec((1, cout, 1),
                             lambda bi, ci, i: (bi * num_chunks + ci, 0, 0)),
                pl.BlockSpec((1, cout, 1),
                             lambda bi, ci, i: (bi * num_chunks + ci, 0, 0)),
            ],
        ),
        compiler_params=pltpu.CompilerParams(
            dimension_semantics=("parallel", "parallel", "arbitrary")),
    )(*operands)


def _bn_affine(ch_sum, ch_sq, gamma, beta, count, eps):
    """Fold BN (training-mode batch statistics) into per-channel scale/shift, (Cout, 1)."""
    s1 = jnp.sum(ch_sum, axis=0)                         # (Cout, 1)
    s2 = jnp.sum(ch_sq, axis=0)
    inv_n = 1.0 / float(count)
    mean = s1 * inv_n
    # single-pass E[x^2]-E[x]^2 (biased), clamped >= 0.  NOTE: can lose precision when
    # |mean| >> std; acceptable for training-mode BN on normalized activations here.
    var = jnp.maximum(s2 * inv_n - mean * mean, 0.0)
    inv_std = jax.lax.rsqrt(var + eps)
    scale = gamma[:, None] * inv_std
    shift = beta[:, None] - mean * scale
    return scale, shift


# ---------------------------------------------------------------------------
# Module forward
# ---------------------------------------------------------------------------
def pointnet2_fp_forward(unknown, known, unknow_feats, known_feats,
                         weights, gammas, betas, *, eps=1e-5,
                         row_tile=512, interp_tile=256):
    """PointNet2FPModule forward (known and unknow_feats both provided)."""
    b, n, _ = unknown.shape
    m = known.shape[1]
    c1 = unknow_feats.shape[1]
    c2 = known_feats.shape[1]

    # ---- point-axis tiling (points live in the lane dimension) ----
    tm = min(row_tile, _round_up(n, 128))
    num_chunks = 2 if _round_up(n, tm) // tm >= 2 else 1      # megacore axis (v7x: 2 TCs)
    n_pad = _round_up(n, tm * num_chunks)
    tiles_per_chunk = n_pad // (tm * num_chunks)
    has_pad = n_pad != n
    tu = math.gcd(tm, _round_up(min(interp_tile, tm), 128))   # interp tile; divides n_pad
    n_total = b * n                                           # BN statistics over all B*n points

    # ---- pad / lay out inputs ----
    m_pad = _round_up(m, 128)
    # padded known points get a large-coordinate sentinel -> huge d2, never selected as NN
    known_p = jnp.pad(known, ((0, 0), (0, m_pad - m), (0, 0)), constant_values=1e6)
    kf_p = jnp.pad(known_feats, ((0, 0), (0, 0), (0, m_pad - m))).astype(jnp.bfloat16)
    unknown_t = jnp.pad(jnp.transpose(unknown, (0, 2, 1)), ((0, 0), (0, 0), (0, n_pad - n)))
    skip = jnp.pad(unknow_feats, ((0, 0), (0, 0), (0, n_pad - n))).astype(jnp.bfloat16)

    # ---- 3-NN inverse-distance interpolation -> (B, C2, n_pad), bf16, channels-first ----
    interp = pl.pallas_call(
        _interp_kernel,
        out_shape=jax.ShapeDtypeStruct((b, c2, n_pad), jnp.bfloat16),
        grid_spec=pltpu.PrefetchScalarGridSpec(
            num_scalar_prefetch=0,
            grid=(b, n_pad // tu),
            in_specs=[
                pl.BlockSpec((1, 3, tu), lambda bi, i: (bi, 0, i)),
                pl.BlockSpec((1, m_pad, 3), lambda bi, i: (bi, 0, 0)),    # resident per batch
                pl.BlockSpec((1, c2, m_pad), lambda bi, i: (bi, 0, 0)),   # resident per batch
            ],
            out_specs=pl.BlockSpec((1, c2, tu), lambda bi, i: (bi, 0, i)),
        ),
        compiler_params=pltpu.CompilerParams(
            dimension_semantics=("parallel", "parallel"),
            # (m_pad, tu) f32 temporaries dominate; keep headroom on v7x's 64 MiB VMEM
            vmem_limit_bytes=48 * 1024 * 1024,
        ),
    )(unknown_t, known_p, kf_p)

    mask_kw = dict(n_valid=n, tm=tm, tiles_per_chunk=tiles_per_chunk, has_pad=has_pad)
    call_kw = dict(b=b, num_chunks=num_chunks, tiles_per_chunk=tiles_per_chunk,
                   tm=tm, n_pad=n_pad)

    # ---- SharedMLP layer 0: concat fused away (two dots), BN stats in the epilogue ----
    cout0 = weights[0].shape[1]
    w0i = jnp.asarray(weights[0][:c2].T, jnp.bfloat16)        # (Cout0, C2) interp half
    w0s = jnp.asarray(weights[0][c2:].T, jnp.bfloat16)        # (Cout0, C1) skip half
    in_specs0 = [
        pl.BlockSpec((1, c2, tm), lambda bi, ci, i: (bi, 0, ci * tiles_per_chunk + i)),
        pl.BlockSpec((1, c1, tm), lambda bi, ci, i: (bi, 0, ci * tiles_per_chunk + i)),
        pl.BlockSpec((cout0, c2), lambda bi, ci, i: (0, 0)),   # weights resident in VMEM
        pl.BlockSpec((cout0, c1), lambda bi, ci, i: (0, 0)),
    ]
    y, s1, s2 = _call_matmul_stats(
        functools.partial(_mlp_first_kernel, **mask_kw),
        (interp, skip, w0i, w0s), in_specs0, cout=cout0, **call_kw)
    scale, shift = _bn_affine(s1, s2, gammas[0], betas[0], n_total, eps)

    # ---- layers 1..L-1: previous BN+ReLU fused into this layer's matmul prologue ----
    for li in range(1, len(weights)):
        cin, cout = weights[li].shape
        w = jnp.asarray(weights[li].T, jnp.bfloat16)          # (Cout, Cin)
        in_specs = [
            pl.BlockSpec((1, cin, tm), lambda bi, ci, i: (bi, 0, ci * tiles_per_chunk + i)),
            pl.BlockSpec((cout, cin), lambda bi, ci, i: (0, 0)),
            pl.BlockSpec((cin, 1), lambda bi, ci, i: (0, 0)),
            pl.BlockSpec((cin, 1), lambda bi, ci, i: (0, 0)),
        ]
        y, s1, s2 = _call_matmul_stats(
            functools.partial(_mlp_mid_kernel, **mask_kw),
            (y, w, scale, shift), in_specs, cout=cout, **call_kw)
        scale, shift = _bn_affine(s1, s2, gammas[li], betas[li], n_total, eps)

    # ---- last layer: standalone fused BN + ReLU apply (f32 output, lane-dense tiles) ----
    cout_last = weights[-1].shape[1]
    out = pl.pallas_call(
        _bn_relu_kernel,
        out_shape=jax.ShapeDtypeStruct((b, cout_last, n_pad), jnp.float32),
        grid_spec=pltpu.PrefetchScalarGridSpec(
            num_scalar_prefetch=0,
            grid=(b, n_pad // tm),
            in_specs=[
                pl.BlockSpec((1, cout_last, tm), lambda bi, i: (bi, 0, i)),
                pl.BlockSpec((cout_last, 1), lambda bi, i: (0, 0)),
                pl.BlockSpec((cout_last, 1), lambda bi, i: (0, 0)),
            ],
            out_specs=pl.BlockSpec((1, cout_last, tm), lambda bi, i: (bi, 0, i)),
        ),
        compiler_params=pltpu.CompilerParams(dimension_semantics=("parallel", "parallel")),
    )(y, scale, shift)

    return out[:, :, :n]                                       # (B, mlp[-1], n)


# ---------------------------------------------------------------------------
# Pure-JAX reference (for correctness check)
# ---------------------------------------------------------------------------
def reference_fp(unknown, known, unknow_feats, known_feats, weights, gammas, betas, eps=1e-5):
    b, n, _ = unknown.shape
    d2 = jnp.sum((unknown[:, :, None, :] - known[:, None, :, :]) ** 2, axis=-1)  # (B,n,m)
    neg, idx = jax.lax.top_k(-d2, 3)                                             # (B,n,3)
    dist = jnp.sqrt(jnp.maximum(-neg, 0.0))
    recip = 1.0 / (dist + 1e-8)
    wgt = recip / jnp.sum(recip, axis=-1, keepdims=True)                         # (B,n,3)
    kf = jnp.transpose(known_feats, (0, 2, 1))                                   # (B,m,C2)
    gathered = jax.vmap(lambda f, i: f[i])(kf, idx)                              # (B,n,3,C2)
    interp = jnp.sum(gathered * wgt[..., None], axis=2)                          # (B,n,C2)

    x = jnp.concatenate([interp, jnp.transpose(unknow_feats, (0, 2, 1))], axis=-1)
    x = x.reshape(b * n, -1)
    for w, g, bt in zip(weights, gammas, betas):
        y = x @ w
        mean = jnp.mean(y, axis=0)
        var = jnp.maximum(jnp.mean(y * y, axis=0) - mean * mean, 0.0)            # biased
        x = jnp.maximum((y - mean) / jnp.sqrt(var + eps) * g + bt, 0.0)
    return jnp.transpose(x.reshape(b, n, -1), (0, 2, 1))


# ---------------------------------------------------------------------------
if __name__ == "__main__":
    key = jax.random.PRNGKey(0)
    k_u, k_k, k_uf, k_kf, k_w, k_g, k_b = jax.random.split(key, 7)

    B, n, m = 2, 64, 32          # unknown / known point counts
    C1, C2 = 6, 10               # skip-connection feats / propagated feats
    mlp = [C1 + C2, 32, 64]      # SharedMLP widths

    unknown = jax.random.normal(k_u, (B, n, 3), jnp.float32)
    known = jax.random.normal(k_k, (B, m, 3), jnp.float32)
    unknow_feats = jax.random.normal(k_uf, (B, C1, n), jnp.float32)
    known_feats = jax.random.normal(k_kf, (B, C2, m), jnp.float32)

    # synthetic SharedMLP parameters (Conv2d 1x1, no bias; BN gamma/beta)
    weights, gammas, betas = [], [], []
    for li in range(len(mlp) - 1):
        kw = jax.random.fold_in(k_w, li)
        kg = jax.random.fold_in(k_g, li)
        kb = jax.random.fold_in(k_b, li)
        weights.append(0.1 * jax.random.normal(kw, (mlp[li], mlp[li + 1]), jnp.float32))
        gammas.append(1.0 + 0.1 * jax.random.normal(kg, (mlp[li + 1],), jnp.float32))
        betas.append(0.1 * jax.random.normal(kb, (mlp[li + 1],), jnp.float32))

    out = pointnet2_fp_forward(unknown, known, unknow_feats, known_feats,
                               weights, gammas, betas, eps=1e-5, row_tile=512)
    out = jax.block_until_ready(out)

    ref = reference_fp(unknown, known, unknow_feats, known_feats,
                       weights, gammas, betas, eps=1e-5)

    assert out.shape == (B, mlp[-1], n), out.shape
    # bf16 MXU operands (activations + weights) vs a pure-f32 reference -> relaxed tolerance
    assert jnp.allclose(out, ref, atol=5e-2, rtol=5e-2), "mismatch vs reference"

    print("KERNEL_OK")
</pallas_src>

<mosaic_0001>
module attributes {stable_mosaic.version = 11 : i64} {
  func.func @_interp_kernel(%arg0: i32, %arg1: i32, %arg2: memref<1x3x128xf32, #tpu.memory_space<vmem>>, %arg3: memref<1x128x3xf32, #tpu.memory_space<vmem>>, %arg4: memref<1x10x128xbf16, #tpu.memory_space<vmem>>, %arg5: memref<1x10x128xbf16, #tpu.memory_space<vmem>>) attributes {dimension_semantics = [#tpu.dimension_semantics<parallel>, #tpu.dimension_semantics<parallel>], iteration_bounds = array<i64: 2, 1>, scalar_prefetch = 0 : i64, scratch_operands = 0 : i64, tpu.core_type = #tpu.core_type<tc>, window_params = [{transform_indices = @transform_0, window_bounds = array<i64: 1, 3, 128>}, {transform_indices = @transform_1, window_bounds = array<i64: 1, 128, 3>}, {transform_indices = @transform_2, window_bounds = array<i64: 1, 10, 128>}, {transform_indices = @transform_3, window_bounds = array<i64: 1, 10, 128>}]} {
    %c0 = arith.constant 0 : index
    %c0_0 = arith.constant 0 : index
    %c0_1 = arith.constant 0 : index
    %0 = vector.load %arg2[%c0, %c0_0, %c0_1] : memref<1x3x128xf32, #tpu.memory_space<vmem>>, vector<1x3x128xf32>
    %1 = vector.shape_cast %0 : vector<1x3x128xf32> to vector<3x128xf32>
    %c0_2 = arith.constant 0 : index
    %c0_3 = arith.constant 0 : index
    %c0_4 = arith.constant 0 : index
    %2 = vector.load %arg3[%c0_2, %c0_3, %c0_4] : memref<1x128x3xf32, #tpu.memory_space<vmem>>, vector<1x128x3xf32>
    %3 = vector.shape_cast %2 : vector<1x128x3xf32> to vector<128x3xf32>
    %cst = arith.constant 0.000000e+00 : f32
    %4 = vector.broadcast %cst : f32 to vector<128x128xf32>
    %5 = vector.extract_strided_slice %3 {offsets = [0, 0], sizes = [128, 1], strides = [1, 1]} : vector<128x3xf32> to vector<128x1xf32>
    %6 = vector.extract_strided_slice %1 {offsets = [0, 0], sizes = [1, 128], strides = [1, 1]} : vector<3x128xf32> to vector<1x128xf32>
    %7 = vector.broadcast %5 : vector<128x1xf32> to vector<128x128xf32>
    %8 = vector.broadcast %6 : vector<1x128xf32> to vector<128x128xf32>
    %9 = arith.subf %7, %8 : vector<128x128xf32>
    %10 = arith.mulf %9, %9 : vector<128x128xf32>
    %11 = arith.addf %4, %10 : vector<128x128xf32>
    %12 = vector.extract_strided_slice %3 {offsets = [0, 1], sizes = [128, 1], strides = [1, 1]} : vector<128x3xf32> to vector<128x1xf32>
    %13 = vector.extract_strided_slice %1 {offsets = [1, 0], sizes = [1, 128], strides = [1, 1]} : vector<3x128xf32> to vector<1x128xf32>
    %14 = vector.broadcast %12 : vector<128x1xf32> to vector<128x128xf32>
    %15 = vector.broadcast %13 : vector<1x128xf32> to vector<128x128xf32>
    %16 = arith.subf %14, %15 : vector<128x128xf32>
    %17 = arith.mulf %16, %16 : vector<128x128xf32>
    %18 = arith.addf %11, %17 : vector<128x128xf32>
    %19 = vector.extract_strided_slice %3 {offsets = [0, 2], sizes = [128, 1], strides = [1, 1]} : vector<128x3xf32> to vector<128x1xf32>
    %20 = vector.extract_strided_slice %1 {offsets = [2, 0], sizes = [1, 128], strides = [1, 1]} : vector<3x128xf32> to vector<1x128xf32>
    %21 = vector.broadcast %19 : vector<128x1xf32> to vector<128x128xf32>
    %22 = vector.broadcast %20 : vector<1x128xf32> to vector<128x128xf32>
    %23 = arith.subf %21, %22 : vector<128x128xf32>
    %24 = arith.mulf %23, %23 : vector<128x128xf32>
    %25 = arith.addf %18, %24 : vector<128x128xf32>
    %26 = tpu.iota {dimensions = array<i32: 0>} : vector<128x128xi32>
    %cst_5 = arith.constant 0.000000e+00 : f32
    %27 = vector.broadcast %cst_5 : f32 to vector<128x128xf32>
    %cst_6 = arith.constant 0.000000e+00 : f32
    %28 = vector.broadcast %cst_6 : f32 to vector<1x128xf32>
    %cst_7 = arith.constant dense<0x7F800000> : vector<128xf32>
    %29 = vector.multi_reduction <minimumf>, %25, %cst_7 [0] : vector<128x128xf32> to vector<128xf32>
    %30 = vector.shape_cast %29 : vector<128xf32> to vector<1x128xf32>
    %31 = vector.broadcast %30 : vector<1x128xf32> to vector<128x128xf32>
    %32 = arith.cmpf oeq, %25, %31 : vector<128x128xf32>
    %c128_i32 = arith.constant 128 : i32
    %33 = vector.broadcast %c128_i32 : i32 to vector<128x128xi32>
    %34 = arith.select %32, %26, %33 : vector<128x128xi1>, vector<128x128xi32>
    %cst_8 = arith.constant dense<2147483647> : vector<128xi32>
    %35 = vector.multi_reduction <minsi>, %34, %cst_8 [0] : vector<128x128xi32> to vector<128xi32>
    %36 = vector.shape_cast %35 : vector<128xi32> to vector<1x128xi32>
    %37 = vector.broadcast %36 : vector<1x128xi32> to vector<128x128xi32>
    %38 = arith.cmpi eq, %26, %37 : vector<128x128xi32>
    %39 = arith.extui %38 : vector<128x128xi1> to vector<128x128xi32>
    %40 = arith.sitofp %39 : vector<128x128xi32> to vector<128x128xf32>
    %41 = math.sqrt %30 : vector<1x128xf32>
    %cst_9 = arith.constant 9.99999993E-9 : f32
    %42 = vector.broadcast %cst_9 : f32 to vector<1x128xf32>
    %43 = arith.addf %41, %42 : vector<1x128xf32>
    %cst_10 = arith.constant 1.000000e+00 : f32
    %44 = vector.broadcast %cst_10 : f32 to vector<1x128xf32>
    %45 = arith.divf %44, %43 : vector<1x128xf32>
    %46 = vector.broadcast %45 : vector<1x128xf32> to vector<128x128xf32>
    %47 = arith.mulf %40, %46 : vector<128x128xf32>
    %48 = arith.addf %27, %47 : vector<128x128xf32>
    %49 = arith.addf %28, %45 : vector<1x128xf32>
    %cst_11 = arith.constant 1.000000e+30 : f32
    %50 = vector.broadcast %cst_11 : f32 to vector<128x128xf32>
    %51 = arith.mulf %40, %50 : vector<128x128xf32>
    %52 = arith.addf %25, %51 : vector<128x128xf32>
    %cst_12 = arith.constant dense<0x7F800000> : vector<128xf32>
    %53 = vector.multi_reduction <minimumf>, %52, %cst_12 [0] : vector<128x128xf32> to vector<128xf32>
    %54 = vector.shape_cast %53 : vector<128xf32> to vector<1x128xf32>
    %55 = vector.broadcast %54 : vector<1x128xf32> to vector<128x128xf32>
    %56 = arith.cmpf oeq, %52, %55 : vector<128x128xf32>
    %c128_i32_13 = arith.constant 128 : i32
    %57 = vector.broadcast %c128_i32_13 : i32 to vector<128x128xi32>
    %58 = arith.select %56, %26, %57 : vector<128x128xi1>, vector<128x128xi32>
    %cst_14 = arith.constant dense<2147483647> : vector<128xi32>
    %59 = vector.multi_reduction <minsi>, %58, %cst_14 [0] : vector<128x128xi32> to vector<128xi32>
    %60 = vector.shape_cast %59 : vector<128xi32> to vector<1x128xi32>
    %61 = vector.broadcast %60 : vector<1x128xi32> to vector<128x128xi32>
    %62 = arith.cmpi eq, %26, %61 : vector<128x128xi32>
    %63 = arith.extui %62 : vector<128x128xi1> to vector<128x128xi32>
    %64 = arith.sitofp %63 : vector<128x128xi32> to vector<128x128xf32>
    %65 = math.sqrt %54 : vector<1x128xf32>
    %cst_15 = arith.constant 9.99999993E-9 : f32
    %66 = vector.broadcast %cst_15 : f32 to vector<1x128xf32>
    %67 = arith.addf %65, %66 : vector<1x128xf32>
    %cst_16 = arith.constant 1.000000e+00 : f32
    %68 = vector.broadcast %cst_16 : f32 to vector<1x128xf32>
    %69 = arith.divf %68, %67 : vector<1x128xf32>
    %70 = vector.broadcast %69 : vector<1x128xf32> to vector<128x128xf32>
    %71 = arith.mulf %64, %70 : vector<128x128xf32>
    %72 = arith.addf %48, %71 : vector<128x128xf32>
    %73 = arith.addf %49, %69 : vector<1x128xf32>
    %cst_17 = arith.constant 1.000000e+30 : f32
    %74 = vector.broadcast %cst_17 : f32 to vector<128x128xf32>
    %75 = arith.mulf %64, %74 : vector<128x128xf32>
    %76 = arith.addf %52, %75 : vector<128x128xf32>
    %cst_18 = arith.constant dense<0x7F800000> : vector<128xf32>
    %77 = vector.multi_reduction <minimumf>, %76, %cst_18 [0] : vector<128x128xf32> to vector<128xf32>
    %78 = vector.shape_cast %77 : vector<128xf32> to vector<1x128xf32>
    %79 = vector.broadcast %78 : vector<1x128xf32> to vector<128x128xf32>
    %80 = arith.cmpf oeq, %76, %79 : vector<128x128xf32>
    %c128_i32_19 = arith.constant 128 : i32
    %81 = vector.broadcast %c128_i32_19 : i32 to vector<128x128xi32>
    %82 = arith.select %80, %26, %81 : vector<128x128xi1>, vector<128x128xi32>
    %cst_20 = arith.constant dense<2147483647> : vector<128xi32>
    %83 = vector.multi_reduction <minsi>, %82, %cst_20 [0] : vector<128x128xi32> to vector<128xi32>
    %84 = vector.shape_cast %83 : vector<128xi32> to vector<1x128xi32>
    %85 = vector.broadcast %84 : vector<1x128xi32> to vector<128x128xi32>
    %86 = arith.cmpi eq, %26, %85 : vector<128x128xi32>
    %87 = arith.extui %86 : vector<128x128xi1> to vector<128x128xi32>
    %88 = arith.sitofp %87 : vector<128x128xi32> to vector<128x128xf32>
    %89 = math.sqrt %78 : vector<1x128xf32>
    %cst_21 = arith.constant 9.99999993E-9 : f32
    %90 = vector.broadcast %cst_21 : f32 to vector<1x128xf32>
    %91 = arith.addf %89, %90 : vector<1x128xf32>
    %cst_22 = arith.constant 1.000000e+00 : f32
    %92 = vector.broadcast %cst_22 : f32 to vector<1x128xf32>
    %93 = arith.divf %92, %91 : vector<1x128xf32>
    %94 = vector.broadcast %93 : vector<1x128xf32> to vector<128x128xf32>
    %95 = arith.mulf %88, %94 : vector<128x128xf32>
    %96 = arith.addf %72, %95 : vector<128x128xf32>
    %97 = arith.addf %73, %93 : vector<1x128xf32>
    %cst_23 = arith.constant 1.000000e+00 : f32
    %98 = vector.broadcast %cst_23 : f32 to vector<1x128xf32>
    %99 = arith.divf %98, %97 : vector<1x128xf32>
    %100 = vector.broadcast %99 : vector<1x128xf32> to vector<128x128xf32>
    %101 = arith.mulf %96, %100 : vector<128x128xf32>
    %102 = arith.truncf %101 : vector<128x128xf32> to vector<128x128xbf16>
    %c0_24 = arith.constant 0 : index
    %c0_25 = arith.constant 0 : index
    %c0_26 = arith.constant 0 : index
    %103 = vector.load %arg4[%c0_24, %c0_25, %c0_26] : memref<1x10x128xbf16, #tpu.memory_space<vmem>>, vector<1x10x128xbf16>
    %104 = vector.shape_cast %103 : vector<1x10x128xbf16> to vector<10x128xbf16>
    %cst_27 = arith.constant dense<0.000000e+00> : vector<10x128xf32>
    %105 = tpu.matmul %104, %102, %cst_27 {dimension_numbers = #tpu.dot_dimension_numbers<[1], [0], [0], [1], [0, 0, 1, 1], [], []>} : vector<10x128xbf16>, vector<128x128xbf16>, vector<10x128xf32> -> vector<10x128xf32>
    %106 = arith.truncf %105 : vector<10x128xf32> to vector<10x128xbf16>
    %c0_28 = arith.constant 0 : index
    %c0_29 = arith.constant 0 : index
    %c0_30 = arith.constant 0 : index
    %107 = vector.load %arg5[%c0_28, %c0_29, %c0_30] : memref<1x10x128xbf16, #tpu.memory_space<vmem>>, vector<1x10x128xbf16>
    %108 = vector.shape_cast %107 : vector<1x10x128xbf16> to vector<10x128xbf16>
    %109 = vector.shape_cast %106 : vector<10x128xbf16> to vector<1x10x128xbf16>
    tpu.vector_store %arg5[%c0_28, %c0_29, %c0_30], %109 {strides = array<i32>} : memref<1x10x128xbf16, #tpu.memory_space<vmem>>, vector<1x10x128xbf16>,
    return
  }
  func.func @transform_0(%arg0: i32, %arg1: i32) -> (i32, i32, i32) {
    %c0_i32 = arith.constant 0 : i32
    %c0_i32_0 = arith.constant 0 : i32
    return %arg0, %c0_i32, %arg1 : i32, i32, i32
  }
  func.func @transform_1(%arg0: i32, %arg1: i32) -> (i32, i32, i32) {
    %c0_i32 = arith.constant 0 : i32
    %c0_i32_0 = arith.constant 0 : i32
    %c0_i32_1 = arith.constant 0 : i32
    return %arg0, %c0_i32, %c0_i32_0 : i32, i32, i32
  }
  func.func @transform_2(%arg0: i32, %arg1: i32) -> (i32, i32, i32) {
    %c0_i32 = arith.constant 0 : i32
    %c0_i32_0 = arith.constant 0 : i32
    %c0_i32_1 = arith.constant 0 : i32
    return %arg0, %c0_i32, %c0_i32_0 : i32, i32, i32
  }
  func.func @transform_3(%arg0: i32, %arg1: i32) -> (i32, i32, i32) {
    %c0_i32 = arith.constant 0 : i32
    %c0_i32_0 = arith.constant 0 : i32
    return %arg0, %c0_i32, %arg1 : i32, i32, i32
  }
}

</mosaic_0001>

<bundles_post_ra>
// kernel: tpu_custom_call.1
= control target key start
LH: loop header
LB: loop body
LE: loop exit
PB: predicated region body
PF: predicated region fallthrough
CT: control target
= control target key end

     0   :  { %s1643_s12 = smov 0   ;;  %s1645_s13 = smov 0   ;;  %s2702_s0 = inlined_call_operand.vmem [shape: f32[2,3,128], index: 0, kind: input, shape index: {}]   ;;  %s2703_s1 = inlined_call_operand.vmem [shape: f32[2,128,3], index: 1, kind: input, shape index: {}]   ;;  %s2704_s2 = inlined_call_operand.vmem [shape: bf16[2,10,128], index: 2, kind: input, shape index: {}]   ;;  %s2705_s3 = inlined_call_operand.vmem [shape: bf16[2,10,128], index: 3, kind: output, shape index: {}]  }
   0x1   :  { %s1647_s14 = smov 0  }
   0x2 LB: > { %s25_s15 = sadd.s32 1, %s1612_s13  ;;  %p1444_p0 = scmp.ge.s32.totalorder %s1616_s14, 1  ;;  %s1616_s14 = sphi %s1647_s14, %s13_s14   ;;  %s1612_s13 = sphi %s1645_s13, %s2780_s13   ;;  %s1608_s12 = sphi %s1643_s12, %s2779_s12  }
   0x3   : > { %p27_p1 = scmp.ge.s32.totalorder %s25_s15, 2  ;;  %p175_p2 = scmp.lt.s32.totalorder %s1616_s14, 3 }
   0x5   : > { %s2782_s15 = smov (%p27_p1, %s25_s15), 0  ;;  %p176_p3 = pnand %p1444_p0, %p175_p2 }
   0x7   : > { %179 = sbr.rel (%p176_p3) target bundleno = 717 (0x2cd), region = 32 }
   0xc   : > { %p214_p4 = scmp.lt.s32.totalorder %s1608_s12, 1  ;;  %v1618_v0 = vmov 0   ;;  %v1619_v10 = vmov 1   ;;  %v1620_v17 = vmov 2   ;;  %v2706_v19 = vmov 0.0  }
   0xd   : > { %1569 = vset.pattern.permute.xlu1 %v1618_v0  ;;  %1568 = vset.pattern.permute.xlu0 %v1618_v0  ;;  %v337_v20 = vlaneseq }
   0xe   : > { %s2784_s12 = smov (!%p214_p4, %s1608_s12), 1  ;;  %1519 = vmatprep.subr.bf16.mxu0 %v2706_v19 }
   0xf   : > { %s1505_s16 = sshll.u32 %s2784_s12, 7  ;;  %s1445_s20 = sshll.u32 %s2784_s12, 2  ;;  %v1691_v23 = vshrl.u32 %v337_v20, 7 }
  0x10   : > { %s1669_s19 = scalar_lea.vmem %s2703_s1, %s1505_s16  ;;  %s220_s23 = scalar_lea.vmem %s2702_s0, %s1445_s20 }
  0x11   : > { %v243_v1 = vld [vmem:[%s1669_s19 + $0x10] sm:$0xff]  ;;  %v241_v2 = vld [vmem:[%s1669_s19] sm:$0xff]  ;;  %v244_v3 = vld [vmem:[%s1669_s19 + $0x18] sm:$0xff]  ;;  %v339_v26 = vsub.s32 0, %v1691_v23  ;;  %v455_v30 = vsub.s32 1, %v1691_v23  ;;  %s1506_s24 = sshll.u32 %s2784_s12, 3 }
  0x12   : > { %269 = vperm.xlu1 %1569, %v243_v1   ;;  %259 = vperm.xlu0 %1568, %v241_v2   ;;  %v242_v4 = vld [vmem:[%s1669_s19 + $0x8] sm:$0xff]  ;;  %v245_v6 = vld [vmem:[%s1669_s19 + $0x20] sm:$0xff]  ;;  %v248_v7 = vld [vmem:[%s1669_s19 + $0x38] sm:$0xff]  ;;  %s2401_s27 = scalar_lea.vmem %s2704_s2, %s1506_s24  ;;  %s238_s30 = scalar_lea.vmem %s2705_s3, %s1506_s24 }
  0x13   : > { %v246_v5 = vld [vmem:[%s1669_s19 + $0x28] sm:$0xff]  ;;  %v247_v8 = vld [vmem:[%s1669_s19 + $0x30] sm:$0xff]  ;;  %v253_v11 = vld [vmem:[%s1669_s19 + $0x60] sm:$0xff] }
  0x14   : > { %v250_v9 = vld [vmem:[%s1669_s19 + $0x48] sm:$0xff]  ;;  %v256_v12 = vld [vmem:[%s1669_s19 + $0x78] sm:$0xff]  ;;  %v249_v13 = vld [vmem:[%s1669_s19 + $0x40] sm:$0xff] }
  0x15   : > { %v251_v14 = vld [vmem:[%s1669_s19 + $0x50] sm:$0xff]  ;;  %v252_v15 = vld [vmem:[%s1669_s19 + $0x58] sm:$0xff]  ;;  %v254_v16 = vld [vmem:[%s1669_s19 + $0x68] sm:$0xff] }
  0x16   : > { %274 = vperm.xlu1 %1569, %v244_v3   ;;  %264 = vperm.xlu0 %1568, %v242_v4   ;;  %v255_v18 = vld [vmem:[%s1669_s19 + $0x70] sm:$0xff]  ;;  %v240_v29 = vld [vmem:[%s220_s23] sm:$0x7] }
  0x17   : > { %v1698_v31 = vrot.slane %v240_v29, %v339_v26  ;;  %v1702_v34 = vrot.slane %v240_v29, %v455_v30 }
  0x1a   : > { %284 = vperm.xlu1 %1569, %v246_v5   ;;  %279 = vperm.xlu0 %1568, %v245_v6  }
  0x1e   : > { %294 = vperm.xlu1 %1569, %v248_v7   ;;  %289 = vperm.xlu0 %1568, %v247_v8  }
  0x22   : > { %1570 = vset.pattern.permute.xlu1 %v1619_v10  ;;  %304 = vperm.xlu0 %1568, %v250_v9  }
  0x23   : > { %394 = vperm.xlu1 %1570, %v242_v4  }
  0x26   : > { %319 = vperm.xlu0 %1568, %v253_v11  }
  0x27   : > { %398 = vperm.xlu1 %1570, %v243_v1  }
  0x2a   : > { %334 = vperm.xlu0 %1568, %v256_v12  }
  0x2b   : > { %406 = vperm.xlu1 %1570, %v245_v6  }
  0x2e   : > { %1575 = vset.pattern.permute.xlu0 %v1619_v10 }
  0x2f   : > { %414 = vperm.xlu1 %1570, %v247_v8   ;;  %390 = vperm.xlu0 %1575, %v241_v2  }
  0x33   : > { %1571 = vset.pattern.permute.xlu1 %v1618_v0  ;;  %402 = vperm.xlu0 %1575, %v244_v3  }
  0x34   : > { %299 = vperm.xlu1 %1571, %v249_v13  }
  0x37   : > { %410 = vperm.xlu0 %1575, %v246_v5  }
  0x38   : > { %309 = vperm.xlu1 %1571, %v251_v14  }
  0x3b   : > { %418 = vperm.xlu0 %1575, %v248_v7  }
  0x3c   : > { %314 = vperm.xlu1 %1571, %v252_v15  }
  0x3f   : > { %422 = vperm.xlu0 %1575, %v249_v13  }
  0x40   : > { %1572 = vset.pattern.permute.xlu1 %v1619_v10 }
  0x41   : > { %426 = vperm.xlu1 %1572, %v250_v9  }
  0x43   : > { %434 = vperm.xlu0 %1575, %v252_v15  }
  0x45   : > { %430 = vperm.xlu1 %1572, %v251_v14  }
  0x47   : > { %442 = vperm.xlu0 %1575, %v254_v16  }
  0x49   : > { %1573 = vset.pattern.permute.xlu1 %v1620_v17 }
  0x4a   : > { %506 = vperm.xlu1 %1573, %v241_v2  }
  0x4b   : > { %1577 = vset.pattern.permute.xlu0 %v1620_v17 }
  0x4c   : > { %510 = vperm.xlu0 %1577, %v242_v4  }
  0x4e   : > { %514 = vperm.xlu1 %1573, %v243_v1  }
  0x50   : > { %522 = vperm.xlu0 %1577, %v245_v6  }
  0x52   : > { %518 = vperm.xlu1 %1573, %v244_v3   ;;  %v571_v3 = vsub.s32 2, %v1691_v23 }
  0x54   : > { %530 = vperm.xlu0 %1577, %v247_v8   ;;  %v1733_v6 = vrot.slane %v240_v29, %v571_v3 }
  0x56   : > { %526 = vperm.xlu1 %1573, %v246_v5  }
  0x58   : > { %538 = vperm.xlu0 %1577, %v249_v13  }
  0x5a   : > { %534 = vperm.xlu1 %1573, %v248_v7  }
  0x5c   : > { %550 = vperm.xlu0 %1577, %v252_v15  }
  0x5e   : > { %1574 = vset.pattern.permute.xlu1 %v1618_v0 }
  0x5f   : > { %324 = vperm.xlu1 %1574, %v254_v16  }
  0x60   : > { %558 = vperm.xlu0 %1577, %v254_v16  }
  0x63   : > { %329 = vperm.xlu1 %1574, %v255_v18  }
  0x64   : > { %566 = vperm.xlu0 %1577, %v256_v12  }
  0x67   : > { %1576 = vset.pattern.permute.xlu1 %v1619_v10 }
  0x68   : > { %438 = vperm.xlu1 %1576, %v253_v11  }
  0x6c   : > { %446 = vperm.xlu1 %1576, %v255_v18  }
  0x70   : > { %450 = vperm.xlu1 %1576, %v256_v12  }
  0x74   : > { %1578 = vset.pattern.permute.xlu1 %v1620_v17 }
  0x75   : > { %542 = vperm.xlu1 %1578, %v250_v9  }
  0x79   : > { %546 = vperm.xlu1 %1578, %v251_v14  }
  0x7d   : > { %554 = vperm.xlu1 %1578, %v253_v11  }
  0x81   : > { %562 = vperm.xlu1 %1578, %v255_v18  }
  0x8d   : > { %v270_v21 = vpop.permute.xlu1 %269  ;;  %v260_v22 = vpop.permute.xlu0 %259 }
  0x8e   : > { %v343_v40 = vsub.f32 %v270_v21, %v1698_v31  ;;  %v341_v8 = vsub.f32 %v260_v22, %v1698_v31 }
  0x90   : > { %v359_v47 = vmul.f32 %v343_v40, %v343_v40  ;;  %v357_v15 = vmul.f32 %v341_v8, %v341_v8 }
  0x91   : > { %v275_v24 = vpop.permute.xlu1 %274  ;;  %v265_v25 = vpop.permute.xlu0 %264 }
  0x92   : > { %v342_v35 = vsub.f32 %v265_v25, %v1698_v31  ;;  %v344_v12 = vsub.f32 %v275_v24, %v1698_v31 }
  0x94   : > { %v358_v38 = vmul.f32 %v342_v35, %v342_v35 }
  0x95   : > { %v285_v27 = vpop.permute.xlu1 %284  ;;  %v280_v28 = vpop.permute.xlu0 %279 }
  0x96   : > { %v345_v44 = vsub.f32 %v280_v28, %v1698_v31  ;;  %v346_v13 = vsub.f32 %v285_v27, %v1698_v31  ;;  %v360_v28 = vmul.f32 %v344_v12, %v344_v12 }
  0x98   : > { %v361_v51 = vmul.f32 %v345_v44, %v345_v44  ;;  %v362_v29 = vmul.f32 %v346_v13, %v346_v13 }
  0x99   : > { %v1700_v32 = vpop.permute.xlu1 %294  ;;  %v290_v33 = vpop.permute.xlu0 %289 }
  0x9a   : > { %v347_v16 = vsub.f32 %v290_v33, %v1698_v31 }
  0x9c   : > { %v363_v35 = vmul.f32 %v347_v16, %v347_v16 }
  0x9d   : > { %v1705_v36 = vpop.permute.xlu0 %304 }
  0x9e   : > { %v395_v37 = vpop.permute.xlu1 %394 }
  0x9f   : > { %v458_v39 = vsub.f32 %v395_v37, %v1702_v34 }
  0xa1   : > { %v474_v41 = vmul.f32 %v458_v39, %v458_v39  ;;  %v1709_v42 = vpop.permute.xlu0 %319 }
  0xa2   : > { %v399_v43 = vpop.permute.xlu1 %398 }
  0xa3   : > { %v1712_v45 = vadd.f32 %v474_v41, %v358_v38  ;;  %v459_v46 = vsub.f32 %v399_v43, %v1702_v34 }
  0xa5   : > { %v475_v48 = vmul.f32 %v459_v46, %v459_v46  ;;  %v1715_v49 = vpop.permute.xlu0 %334 }
  0xa6   : > { %v407_v50 = vpop.permute.xlu1 %406 }
  0xa7   : > { %v1717_v52 = vadd.f32 %v475_v48, %v359_v47  ;;  %v461_v53 = vsub.f32 %v407_v50, %v1702_v34 }
  0xa9   : > { %v477_v54 = vmul.f32 %v461_v53, %v461_v53 }
  0xaa   : > { %v415_v55 = vpop.permute.xlu1 %414  ;;  %v391_v56 = vpop.permute.xlu0 %390 }
  0xab   : > { %v493_v57 = vadd.f32 %v477_v54, %v361_v51  ;;  %v457_v9 = vsub.f32 %v391_v56, %v1702_v34  ;;  %v463_v17 = vsub.f32 %v415_v55, %v1702_v34  ;;  %v348_v51 = vsub.f32 %v1700_v32, %v1698_v31 }
  0xad   : > { %v473_v18 = vmul.f32 %v457_v9, %v457_v9  ;;  %v479_v33 = vmul.f32 %v463_v17, %v463_v17  ;;  %v364_v12 = vmul.f32 %v348_v51, %v348_v51  ;;  %v356_v51 = vsub.f32 %v1715_v49, %v1698_v31 }
  0xae   : > { %v403_v58 = vpop.permute.xlu0 %402 }
  0xaf   : > { %v300_v59 = vpop.permute.xlu1 %299  ;;  %v489_v37 = vadd.f32 %v473_v18, %v357_v15  ;;  %v460_v39 = vsub.f32 %v403_v58, %v1702_v34  ;;  %v495_v58 = vadd.f32 %v479_v33, %v363_v35 }
  0xb0   : > { %v349_v40 = vsub.f32 %v300_v59, %v1698_v31 }
  0xb2   : > { %v411_v60 = vpop.permute.xlu0 %410 }
  0xb3   : > { %v1720_v61 = vpop.permute.xlu1 %309  ;;  %v462_v20 = vsub.f32 %v411_v60, %v1702_v34 }
  0xb5   : > { %v478_v41 = vmul.f32 %v462_v20, %v462_v20 }
  0xb6   : > { %v419_v62 = vpop.permute.xlu0 %418 }
  0xb7   : > { %v1722_v63 = vpop.permute.xlu1 %314  ;;  %v464_v43 = vsub.f32 %v419_v62, %v1702_v34  ;;  %v494_v3 = vadd.f32 %v478_v41, %v362_v29  ;;  %v350_v41 = vsub.f32 %v1705_v36, %v1698_v31 }
  0xb9   : > { %v366_v36 = vmul.f32 %v350_v41, %v350_v41 }
  0xba   : > { %v423_v0 = vpop.permute.xlu0 %422 }
  0xbb   : > { %v465_v24 = vsub.f32 %v423_v0, %v1702_v34  ;;  %v476_v0 = vmul.f32 %v460_v39, %v460_v39 }
  0xbc   : > { %v1724_v1 = vpop.permute.xlu1 %426 }
  0xbd   : > { %v481_v53 = vmul.f32 %v465_v24, %v465_v24 }
  0xbe   : > { %v1726_v2 = vpop.permute.xlu0 %434 }
  0xc0   : > { %v1729_v4 = vpop.permute.xlu1 %430 }
  0xc2   : > { %v1731_v5 = vpop.permute.xlu0 %442 }
  0xc5   : > { %v507_v7 = vpop.permute.xlu1 %506 }
  0xc6   : > { %v573_v11 = vsub.f32 %v507_v7, %v1733_v6  ;;  %v480_v7 = vmul.f32 %v464_v43, %v464_v43  ;;  %v467_v43 = vsub.f32 %v1729_v4, %v1702_v34  ;;  %v468_v4 = vsub.f32 %v1726_v2, %v1702_v34 }
  0xc7   : > { %v511_v10 = vpop.permute.xlu0 %510  ;;  %v372_v2 = vmul.f32 %v356_v51, %v356_v51 }
  0xc8   : > { %v589_v22 = vmul.f32 %v573_v11, %v573_v11  ;;  %v574_v27 = vsub.f32 %v511_v10, %v1733_v6 }
  0xc9   : > { %v515_v14 = vpop.permute.xlu1 %514 }
  0xca   : > { %v575_v25 = vsub.f32 %v515_v14, %v1733_v6  ;;  %v1750_v46 = vadd.f32 %v589_v22, %v489_v37  ;;  %v590_v54 = vmul.f32 %v574_v27, %v574_v27  ;;  %v496_v22 = vadd.f32 %v480_v7, %v364_v12 }
  0xcb   : > { %v523_v21 = vpop.permute.xlu0 %522 }
  0xcc   : > { %v577_v26 = vsub.f32 %v523_v21, %v1733_v6  ;;  %v591_v47 = vmul.f32 %v575_v25, %v575_v25  ;;  %v1768_v14 = vadd.f32 %v590_v54, %v1712_v45  ;;  %v492_v21 = vadd.f32 %v476_v0, %v360_v28 }
  0xcd   : > { %v519_v30 = vpop.permute.xlu1 %518 }
  0xce   : > { %v593_v38 = vmul.f32 %v577_v26, %v577_v26  ;;  %v576_v55 = vsub.f32 %v519_v30, %v1733_v6  ;;  %v1762_v9 = vadd.f32 %v591_v47, %v1717_v52  ;;  %v351_v47 = vsub.f32 %v1720_v61, %v1698_v31 }
  0xcf   : > { %v531_v44 = vpop.permute.xlu0 %530  ;;  %v470_v61 = vsub.f32 %v1731_v5, %v1702_v34 }
  0xd0   : > { %v1752_v48 = vadd.f32 %v593_v38, %v493_v57  ;;  %v579_v50 = vsub.f32 %v531_v44, %v1733_v6  ;;  %v365_v57 = vmul.f32 %v349_v40, %v349_v40  ;;  %v592_v15 = vmul.f32 %v576_v55, %v576_v55 }
  0xd1   : > { %v527_v56 = vpop.permute.xlu1 %526  ;;  %v466_v40 = vsub.f32 %v1724_v1, %v1702_v34  ;;  %v353_v44 = vsub.f32 %v1709_v42, %v1698_v31 }
  0xd2   : > { %v638_v59 = vmin.f32 %v1750_v46, %v1752_v48  ;;  %v595_v60 = vmul.f32 %v579_v50, %v579_v50  ;;  %v578_v62 = vsub.f32 %v527_v56, %v1733_v6  ;;  %v497_v13 = vadd.f32 %v481_v53, %v365_v57 }
  0xd3   : > { %v539_v8 = vpop.permute.xlu0 %538  ;;  %v1779_v45 = vadd.f32 %v592_v15, %v492_v21  ;;  %v482_v53 = vmul.f32 %v466_v40, %v466_v40  ;;  %v483_v56 = vmul.f32 %v467_v43, %v467_v43 }
  0xd4   : > { %v1764_v32 = vadd.f32 %v595_v60, %v495_v58  ;;  %v594_v10 = vmul.f32 %v578_v62, %v578_v62  ;;  %v581_v11 = vsub.f32 %v539_v8, %v1733_v6  ;;  %v369_v58 = vmul.f32 %v353_v44, %v353_v44 }
  0xd5   : > { %v535_v16 = vpop.permute.xlu1 %534  ;;  %v367_v60 = vmul.f32 %v351_v47, %v351_v47  ;;  %v352_v62 = vsub.f32 %v1722_v63, %v1698_v31  ;;  %v498_v7 = vadd.f32 %v482_v53, %v366_v36 }
  0xd6   : > { %v640_v17 = vmin.f32 %v1762_v9, %v1764_v32  ;;  %v1772_v18 = vadd.f32 %v594_v10, %v494_v3  ;;  %v597_v20 = vmul.f32 %v581_v11, %v581_v11  ;;  %v580_v52 = vsub.f32 %v535_v16, %v1733_v6 }
  0xd7   : > { %v551_v38 = vpop.permute.xlu0 %550  ;;  %v484_v11 = vmul.f32 %v468_v4, %v468_v4  ;;  %v499_v12 = vadd.f32 %v483_v56, %v367_v60  ;;  %v486_v16 = vmul.f32 %v470_v61, %v470_v61  ;;  %v368_v21 = vmul.f32 %v352_v62, %v352_v62 }
  0xd8   : > { %v639_v25 = vmin.f32 %v1768_v14, %v1772_v18  ;;  %v1777_v26 = vadd.f32 %v597_v20, %v497_v13  ;;  %v596_v29 = vmul.f32 %v580_v52, %v580_v52  ;;  %v584_v0 = vsub.f32 %v551_v38, %v1733_v6 }
  0xd9   : > { %v500_v43 = vadd.f32 %v484_v11, %v368_v21  ;;  %v1862_v11 = vadd.s32 40, %v1691_v23  ;;  %v1885_v21 = vadd.s32 96, %v1691_v23 }
  0xda   : > { %v1782_v24 = vmin.f32 %v638_v59, %v1777_v26  ;;  %v1784_v27 = vadd.f32 %v596_v29, %v496_v22  ;;  %v325_v30 = vpop.permute.xlu1 %324  ;;  %v600_v22 = vmul.f32 %v584_v0, %v584_v0 }
  0xdb   : > { %v354_v54 = vsub.f32 %v325_v30, %v1698_v31  ;;  %v559_v1 = vpop.permute.xlu0 %558  ;;  %2733 = vst [vmem:[#allocation7_spill] sm:$0xff] %v1885_v21 }
  0xdc   : > { %v641_v35 = vmin.f32 %v1779_v45, %v1784_v27  ;;  %v586_v57 = vsub.f32 %v559_v1, %v1733_v6 }
  0xdd   : > { %v370_v8 = vmul.f32 %v354_v54, %v354_v54 }
  0xde   : > { %v330_v33 = vpop.permute.xlu1 %329  ;;  %v602_v29 = vmul.f32 %v586_v57, %v586_v57 }
  0xdf   : > { %v567_v13 = vpop.permute.xlu0 %566  ;;  %v355_v30 = vsub.f32 %v330_v33, %v1698_v31  ;;  %v502_v38 = vadd.f32 %v486_v16, %v370_v8  ;;  %v1859_v8 = vadd.s32 32, %v1691_v23  ;;  %v1877_v16 = vadd.s32 80, %v1691_v23 }
  0xe1   : > { %v371_v51 = vmul.f32 %v355_v30, %v355_v30  ;;  %v1831_v54 = vadd.f32 %v602_v29, %v502_v38  ;;  %2731 = vst [vmem:[#allocation5_spill] sm:$0xff] %v1877_v16  ;;  %v1891_v29 = vadd.s32 112, %v1691_v23  ;;  %v1894_v30 = vadd.s32 120, %v1691_v23 }
  0xe3   : > { %v439_v28 = vpop.permute.xlu1 %438  ;;  %2735 = vst [vmem:[#allocation9_spill] sm:$0xff] %v1891_v29  ;;  %2736 = vst [vmem:[#allocation10_spill] sm:$0xff] %v1894_v30 }
  0xe4   : > { %v469_v42 = vsub.f32 %v439_v28, %v1702_v34 }
  0xe6   : > { %v485_v5 = vmul.f32 %v469_v42, %v469_v42 }
  0xe7   : > { %v447_v37 = vpop.permute.xlu1 %446 }
  0xe8   : > { %v471_v15 = vsub.f32 %v447_v37, %v1702_v34 }
  0xea   : > { %v487_v37 = vmul.f32 %v471_v15, %v471_v15  ;;  %v1874_v15 = vadd.s32 72, %v1691_v23 }
  0xeb   : > { %v451_v39 = vpop.permute.xlu1 %450 }
  0xec   : > { %v472_v59 = vsub.f32 %v451_v39, %v1702_v34  ;;  %v588_v39 = vsub.f32 %v567_v13, %v1733_v6  ;;  %v501_v34 = vadd.f32 %v485_v5, %v369_v58  ;;  %v503_v4 = vadd.f32 %v487_v37, %v371_v51  ;;  %2730 = vst [vmem:[#allocation4_spill] sm:$0xff] %v1874_v15 }
  0xed   : > { %v1868_v5 = vadd.s32 56, %v1691_v23  ;;  %v1871_v13 = vadd.s32 64, %v1691_v23 }
  0xee   : > { %v488_v20 = vmul.f32 %v472_v59, %v472_v59  ;;  %v604_v1 = vmul.f32 %v588_v39, %v588_v39 }
  0xef   : > { %2728 = vst [vmem:[#allocation2_spill] sm:$0xff] %v1868_v5  ;;  %2729 = vst [vmem:[#allocation3_spill] sm:$0xff] %v1871_v13 }
  0xf0   : > { %v543_v50 = vpop.permute.xlu1 %542  ;;  %v504_v44 = vadd.f32 %v488_v20, %v372_v2  ;;  %v1880_v20 = vadd.s32 88, %v1691_v23 }
  0xf1   : > { %v582_v55 = vsub.f32 %v543_v50, %v1733_v6  ;;  %v1829_v50 = vadd.f32 %v600_v22, %v500_v43  ;;  %v1888_v22 = vadd.s32 104, %v1691_v23 }
  0xf2   : > { %v1836_v56 = vadd.f32 %v604_v1, %v504_v44  ;;  %2732 = vst [vmem:[#allocation6_spill] sm:$0xff] %v1880_v20 }
  0xf3   : > { %v598_v49 = vmul.f32 %v582_v55, %v582_v55  ;;  %v645_v58 = vmin.f32 %v641_v35, %v1829_v50  ;;  %v1856_v35 = vadd.s32 24, %v1691_v23  ;;  %2734 = vst [vmem:[#allocation8_spill] sm:$0xff] %v1888_v22 }
  0xf4   : > { %v547_v3 = vpop.permute.xlu1 %546 }
  0xf5   : > { %v583_v10 = vsub.f32 %v547_v3, %v1733_v6  ;;  %v1814_v52 = vadd.f32 %v598_v49, %v498_v7  ;;  %v649_v49 = vmin.f32 %v645_v58, %v1836_v56  ;;  %v1853_v7 = vadd.s32 16, %v1691_v23 }
  0xf7   : > { %v599_v63 = vmul.f32 %v583_v10, %v583_v10  ;;  %v643_v47 = vmin.f32 %v639_v25, %v1814_v52 }
  0xf8   : > { %v555_v28 = vpop.permute.xlu1 %554 }
  0xf9   : > { %v1818_v40 = vadd.f32 %v599_v63, %v499_v12  ;;  %v585_v41 = vsub.f32 %v555_v28, %v1733_v6  ;;  %v647_v25 = vmin.f32 %v643_v47, %v1831_v54  ;;  %v1865_v12 = vadd.s32 48, %v1691_v23 }
  0xfb   : > { %v644_v31 = vmin.f32 %v640_v17, %v1818_v40  ;;  %v601_v33 = vmul.f32 %v585_v41, %v585_v41 }
  0xfc   : > { %v563_v53 = vpop.permute.xlu1 %562 }
  0xfd   : > { %v1833_v55 = vadd.f32 %v601_v33, %v501_v34  ;;  %v587_v36 = vsub.f32 %v563_v53, %v1733_v6 }
  0xff   : > { %v646_v17 = vmin.f32 %v1782_v24, %v1833_v55  ;;  %v603_v42 = vmul.f32 %v587_v36, %v587_v36  ;;  %v1850_v24 = vadd.s32 8, %v1691_v23 }
 0x101   : > { %v650_v61 = vmin.f32 %v646_v17, %v647_v25  ;;  %v1845_v59 = vadd.f32 %v603_v42, %v503_v4 }
 0x103   : > { %v648_v6 = vmin.f32 %v644_v31, %v1845_v59 }
 0x105   : > { %v651_v60 = vmin.f32 %v648_v6, %v649_v49 }
 0x107   : > { %v652_v62 = vmin.f32 %v650_v61, %v651_v60 }
 0x109   : > { %v653_v0 = vrot.slane %v652_v62, 4 }
 0x10b   : > { %v654_v57 = vmin.f32 %v652_v62, %v653_v0 }
 0x10d   : > { %v655_v3 = vrot.slane %v654_v57, 2 }
 0x10f   : > { %v656_v2 = vmin.f32 %v654_v57, %v655_v3 }
 0x111   : > { %v657_v10 = vrot.slane %v656_v2, 1 }
 0x113   : > { %v1882_v63 = vmin.f32 %v656_v2, %v657_v10 }
 0x115   : > { %vm659_vm0 = vcmp.eq.f32.partialorder %v1750_v46, %v1882_v63  ;;  %vm660_vm1 = vcmp.eq.f32.partialorder %v1768_v14, %v1882_v63  ;;  %vm661_vm2 = vcmp.eq.f32.partialorder %v1762_v9, %v1882_v63  ;;  %vm662_vm3 = vcmp.eq.f32.partialorder %v1779_v45, %v1882_v63 }
 0x116   : > { %vm663_vm4 = vcmp.eq.f32.partialorder %v1752_v48, %v1882_v63  ;;  %vm664_vm5 = vcmp.eq.f32.partialorder %v1772_v18, %v1882_v63  ;;  %vm665_vm6 = vcmp.eq.f32.partialorder %v1764_v32, %v1882_v63  ;;  %vm666_vm7 = vcmp.eq.f32.partialorder %v1784_v27, %v1882_v63 }
 0x117   : > { %vm667_vm8 = vcmp.eq.f32.partialorder %v1777_v26, %v1882_v63  ;;  %vm668_vm9 = vcmp.eq.f32.partialorder %v1814_v52, %v1882_v63  ;;  %vm669_vm10 = vcmp.eq.f32.partialorder %v1818_v40, %v1882_v63  ;;  %vm670_vm11 = vcmp.eq.f32.partialorder %v1829_v50, %v1882_v63 }
 0x118   : > { %vm671_vm12 = vcmp.eq.f32.partialorder %v1833_v55, %v1882_v63  ;;  %vm672_vm13 = vcmp.eq.f32.partialorder %v1831_v54, %v1882_v63  ;;  %vm673_vm14 = vcmp.eq.f32.partialorder %v1845_v59, %v1882_v63  ;;  %vm674_vm15 = vcmp.eq.f32.partialorder %v1836_v56, %v1882_v63 }
 0x119   : > { %v675_v28 = vsel %vm659_vm0, %v1691_v23, 128  ;;  %v676_v38 = vsel %vm660_vm1, %v1850_v24, 128  ;;  %v677_v39 = vsel %vm661_vm2, %v1853_v7, 128  ;;  %v678_v41 = vsel %vm662_vm3, %v1856_v35, 128 }
 0x11a   : > { %v679_v43 = vsel %vm663_vm4, %v1859_v8, 128  ;;  %v680_v34 = vsel %vm664_vm5, %v1862_v11, 128  ;;  %v681_v37 = vsel %vm665_vm6, %v1865_v12, 128  ;;  %v682_v44 = vsel %vm666_vm7, %v1868_v5, 128 }
 0x11b   : > { %v683_v47 = vsel %vm667_vm8, %v1871_v13, 128  ;;  %v684_v31 = vsel %vm668_vm9, %v1874_v15, 128  ;;  %v685_v33 = vsel %vm669_vm10, %v1877_v16, 128  ;;  %v686_v51 = vsel %vm670_vm11, %v1880_v20, 128 }
 0x11c   : > { %v687_v53 = vsel %vm671_vm12, %v1885_v21, 128  ;;  %v688_v1 = vsel %vm672_vm13, %v1888_v22, 128  ;;  %v689_v36 = vsel %vm673_vm14, %v1891_v29, 128  ;;  %v690_v4 = vsel %vm674_vm15, %v1894_v30, 128 }
 0x11d   : > { %vm691_vm0 = vcmp.lt.s32.totalorder %v675_v28, %v679_v43  ;;  %vm693_vm1 = vcmp.lt.s32.totalorder %v676_v38, %v680_v34  ;;  %vm695_vm2 = vcmp.lt.s32.totalorder %v677_v39, %v681_v37  ;;  %vm697_vm3 = vcmp.lt.s32.totalorder %v678_v41, %v682_v44 }
 0x11e   : > { %v692_v25 = vsel %vm691_vm0, %v675_v28, %v679_v43  ;;  %v694_v17 = vsel %vm693_vm1, %v676_v38, %v680_v34  ;;  %v696_v42 = vsel %vm695_vm2, %v677_v39, %v681_v37  ;;  %v698_v58 = vsel %vm697_vm3, %v678_v41, %v682_v44 }
 0x11f   : > { %vm699_vm4 = vcmp.lt.s32.totalorder %v692_v25, %v683_v47  ;;  %vm701_vm5 = vcmp.lt.s32.totalorder %v694_v17, %v684_v31  ;;  %vm703_vm6 = vcmp.lt.s32.totalorder %v696_v42, %v685_v33  ;;  %vm705_vm7 = vcmp.lt.s32.totalorder %v698_v58, %v686_v51 }
 0x120   : > { %v700_v61 = vsel %vm699_vm4, %v692_v25, %v683_v47  ;;  %v702_v49 = vsel %vm701_vm5, %v694_v17, %v684_v31  ;;  %v704_v6 = vsel %vm703_vm6, %v696_v42, %v685_v33  ;;  %v706_v60 = vsel %vm705_vm7, %v698_v58, %v686_v51 }
 0x121   : > { %vm707_vm8 = vcmp.lt.s32.totalorder %v700_v61, %v687_v53  ;;  %vm709_vm9 = vcmp.lt.s32.totalorder %v702_v49, %v688_v1  ;;  %vm711_vm10 = vcmp.lt.s32.totalorder %v704_v6, %v689_v36  ;;  %vm713_vm11 = vcmp.lt.s32.totalorder %v706_v60, %v690_v4 }
 0x122   : > { %v708_v62 = vsel %vm707_vm8, %v700_v61, %v687_v53  ;;  %v710_v0 = vsel %vm709_vm9, %v702_v49, %v688_v1  ;;  %v712_v57 = vsel %vm711_vm10, %v704_v6, %v689_v36  ;;  %v714_v3 = vsel %vm713_vm11, %v706_v60, %v690_v4 }
 0x123   : > { %vm715_vm12 = vcmp.lt.s32.totalorder %v708_v62, %v710_v0  ;;  %vm717_vm13 = vcmp.lt.s32.totalorder %v712_v57, %v714_v3  ;;  %1580 = vrsqrt.f32 %v1882_v63  ;;  %vm780_vm2 = vcmp.eq.f32.partialorder %v1882_v63, inf }
 0x124   : > { %v716_v2 = vsel %vm715_vm12, %v708_v62, %v710_v0  ;;  %v718_v10 = vsel %vm717_vm13, %v712_v57, %v714_v3  ;;  %vm782_vm3 = vcmp.eq.f32.partialorder %v1882_v63, 0.0  ;;  %v783_v31 = vand.u32 2147483648, %v1882_v63 }
 0x125   : > { %vm719_vm14 = vcmp.lt.s32.totalorder %v716_v2, %v718_v10 }
 0x126   : > { %v720_v28 = vsel %vm719_vm14, %v716_v2, %v718_v10 }
 0x127   : > { %v721_v38 = vrot.slane %v720_v28, 4 }
 0x129   : > { %vm722_vm15 = vcmp.lt.s32.totalorder %v720_v28, %v721_v38 }
 0x12a   : > { %v723_v39 = vsel %vm722_vm15, %v720_v28, %v721_v38 }
 0x12b   : > { %v724_v41 = vrot.slane %v723_v39, 2 }
 0x12d   : > { %vm725_vm0 = vcmp.lt.s32.totalorder %v723_v39, %v724_v41 }
 0x12e   : > { %v726_v43 = vsel %vm725_vm0, %v723_v39, %v724_v41 }
 0x12f   : > { %v727_v34 = vrot.slane %v726_v43, 1 }
 0x130   : > { %v1581_v37 = vpop.eup %1580 }
 0x131   : > { %vm728_vm1 = vcmp.lt.s32.totalorder %v726_v43, %v727_v34  ;;  %v779_v44 = vmul.f32 %v1581_v37, %v1882_v63 }
 0x132   : > { %v729_v47 = vsel %vm728_vm1, %v726_v43, %v727_v34 }
 0x133   : > { %vm732_vm4 = vcmp.eq.s32.totalorder %v1853_v7, %v729_v47  ;;  %vm736_vm5 = vcmp.eq.s32.totalorder %v1865_v12, %v729_v47  ;;  %vm740_vm6 = vcmp.eq.s32.totalorder %v1877_v16, %v729_v47  ;;  %vm744_vm7 = vcmp.eq.s32.totalorder %v1891_v29, %v729_v47 }
 0x134   : > { %v2002_v33 = vsel %vm732_vm4, 1.0, %v2706_v19  ;;  %v2005_v51 = vsel %vm736_vm5, 1.0, %v2706_v19  ;;  %v2008_v53 = vsel %vm740_vm6, 1.0, %v2706_v19  ;;  %v2011_v1 = vsel %vm744_vm7, 1.0, %v2706_v19 }
 0x135   : > { %v781_v36 = vsel %vm780_vm2, %v1882_v63, %v779_v44  ;;  %v823_v4 = vmul.f32 1e+30, %v2002_v33  ;;  %v827_v25 = vmul.f32 1e+30, %v2005_v51  ;;  %v831_v17 = vmul.f32 1e+30, %v2008_v53 }
 0x136   : > { %v784_v42 = vsel %vm782_vm3, %v783_v31, %v781_v36  ;;  %v835_v58 = vmul.f32 1e+30, %v2011_v1  ;;  %vm730_vm8 = vcmp.eq.s32.totalorder %v1691_v23, %v729_v47  ;;  %vm731_vm9 = vcmp.eq.s32.totalorder %v1850_v24, %v729_v47 }
 0x137   : > { %v785_v61 = vadd.f32 1e-08, %v784_v42  ;;  %v2021_v49 = vadd.f32 %v823_v4, %v1762_v9  ;;  %v2024_v6 = vadd.f32 %v827_v25, %v1764_v32  ;;  %v2027_v63 = vadd.f32 %v831_v17, %v1818_v40 }
 0x138   : > { %v2030_v60 = vadd.f32 %v835_v58, %v1845_v59  ;;  %vm733_vm10 = vcmp.eq.s32.totalorder %v1856_v35, %v729_v47  ;;  %vm734_vm11 = vcmp.eq.s32.totalorder %v1859_v8, %v729_v47  ;;  %vm735_vm12 = vcmp.eq.s32.totalorder %v1862_v11, %v729_v47 }
 0x139   : > { %1582 = vrcp.f32 %v785_v61  ;;  %v855_v9 = vmin.f32 %v2021_v49, %v2024_v6  ;;  %vm737_vm13 = vcmp.eq.s32.totalorder %v1868_v5, %v729_v47  ;;  %vm738_vm14 = vcmp.eq.s32.totalorder %v1871_v13, %v729_v47 }
 0x13a   : > { %vm739_vm15 = vcmp.eq.s32.totalorder %v1874_v15, %v729_v47  ;;  %vm741_vm0 = vcmp.eq.s32.totalorder %v1880_v20, %v729_v47  ;;  %vm742_vm1 = vcmp.eq.s32.totalorder %v1885_v21, %v729_v47  ;;  %vm743_vm2 = vcmp.eq.s32.totalorder %v1888_v22, %v729_v47 }
 0x13b   : > { %v2044_v32 = vmin.f32 %v855_v9, %v2027_v63  ;;  %vm745_vm3 = vcmp.eq.s32.totalorder %v1894_v30, %v729_v47  ;;  %v2050_v40 = vsel %vm730_vm8, 1.0, %v2706_v19  ;;  %v2055_v59 = vsel %vm731_vm9, 1.0, %v2706_v19 }
 0x13c   : > { %v1455_v62 = vsel %vm733_vm10, 1.0, %v2706_v19  ;;  %v1456_v0 = vsel %vm734_vm11, 1.0, %v2706_v19  ;;  %v1457_v57 = vsel %vm735_vm12, 1.0, %v2706_v19  ;;  %v1459_v3 = vsel %vm737_vm13, 1.0, %v2706_v19 }
 0x13d   : > { %v863_v2 = vmin.f32 %v2044_v32, %v2030_v60  ;;  %v1460_v10 = vsel %vm738_vm14, 1.0, %v2706_v19  ;;  %v1461_v28 = vsel %vm739_vm15, 1.0, %v2706_v19  ;;  %v1463_v38 = vsel %vm741_vm0, 1.0, %v2706_v19 }
 0x13e   : > { %v1464_v39 = vsel %vm742_vm1, 1.0, %v2706_v19  ;;  %v1465_v41 = vsel %vm743_vm2, 1.0, %v2706_v19  ;;  %v1467_v43 = vsel %vm745_vm3, 1.0, %v2706_v19  ;;  %v821_v34 = vmul.f32 1e+30, %v2050_v40 }
 0x13f   : > { %v822_v37 = vmul.f32 1e+30, %v2055_v59  ;;  %v824_v44 = vmul.f32 1e+30, %v1455_v62  ;;  %v825_v47 = vmul.f32 1e+30, %v1456_v0 }
 0x140   : > { %v826_v31 = vmul.f32 1e+30, %v1457_v57  ;;  %v828_v36 = vmul.f32 1e+30, %v1459_v3  ;;  %v829_v4 = vmul.f32 1e+30, %v1460_v10  ;;  %v2072_v25 = vadd.f32 %v821_v34, %v1750_v46 }
 0x141   : > { %v830_v17 = vmul.f32 1e+30, %v1461_v28  ;;  %v832_v42 = vmul.f32 1e+30, %v1463_v38  ;;  %v833_v58 = vmul.f32 1e+30, %v1464_v39  ;;  %v2075_v61 = vadd.f32 %v822_v37, %v1768_v14 }
 0x142   : > { %v834_v9 = vmul.f32 1e+30, %v1465_v41  ;;  %v836_v32 = vmul.f32 1e+30, %v1467_v43  ;;  %v2078_v19 = vadd.f32 %v824_v44, %v1779_v45  ;;  %v2081_v30 = vadd.f32 %v825_v47, %v1752_v48 }
 0x143   : > { %v2084_v29 = vadd.f32 %v826_v31, %v1772_v18  ;;  %v2087_v46 = vadd.f32 %v828_v36, %v1784_v27  ;;  %v2090_v34 = vadd.f32 %v829_v4, %v1777_v26  ;;  %v2093_v14 = vadd.f32 %v830_v17, %v1814_v52 }
 0x144   : > { %v853_v37 = vmin.f32 %v2072_v25, %v2081_v30  ;;  %v2104_v27 = vadd.f32 %v832_v42, %v1829_v50  ;;  %v2107_v26 = vadd.f32 %v833_v58, %v1833_v55  ;;  %v2110_v52 = vadd.f32 %v834_v9, %v1831_v54 }
 0x145   : > { %v854_v45 = vmin.f32 %v2075_v61, %v2084_v29  ;;  %v856_v48 = vmin.f32 %v2078_v19, %v2087_v46  ;;  %v2113_v44 = vadd.f32 %v836_v32, %v1836_v56 }
 0x146   : > { %v2101_v18 = vpop.eup %1582  ;;  %v857_v36 = vmin.f32 %v853_v37, %v2090_v34 }
 0x147   : > { %v2117_v47 = vmul.f32 %v2101_v18, %v2011_v1  ;;  %v2120_v31 = vmul.f32 %v2101_v18, %v1467_v43  ;;  %v858_v50 = vmin.f32 %v854_v45, %v2093_v14  ;;  %v860_v55 = vmin.f32 %v856_v48, %v2104_v27 }
 0x148   : > { %v2126_v4 = vmul.f32 %v2101_v18, %v1464_v39  ;;  %v2129_v54 = vmul.f32 %v2101_v18, %v1465_v41  ;;  %v2133_v56 = vmul.f32 %v2101_v18, %v2008_v53  ;;  %v861_v1 = vmin.f32 %v857_v36, %v2107_v26 }
 0x149   : > { %v862_v43 = vmin.f32 %v858_v50, %v2110_v52  ;;  %v2138_v17 = vmul.f32 %v2101_v18, %v1463_v38  ;;  %v2141_v42 = vmul.f32 %v2101_v18, %v1460_v10  ;;  %v864_v39 = vmin.f32 %v860_v55, %v2113_v44 }
 0x14a   : > { %2737 = vst [vmem:[#allocation11_spill] sm:$0xff] %v2126_v4  ;;  %2738 = vst [vmem:[#allocation12_spill] sm:$0xff] %v2129_v54  ;;  %v2145_v58 = vmul.f32 %v2101_v18, %v1461_v28  ;;  %v2149_v41 = vmul.f32 %v2101_v18, %v2005_v51  ;;  %v2152_v53 = vmul.f32 %v2101_v18, %v1459_v3 }
 0x14b   : > { %2739 = vst [vmem:[#allocation13_spill] sm:$0xff] %v2133_v56  ;;  %2740 = vst [vmem:[#allocation14_spill] sm:$0xff] %v2138_v17  ;;  %v865_v9 = vmin.f32 %v861_v1, %v862_v43  ;;  %v2155_v32 = vmul.f32 %v2101_v18, %v1456_v0  ;;  %v2158_v38 = vmul.f32 %v2101_v18, %v1457_v57 }
 0x14c   : > { %2741 = vst [vmem:[#allocation15_spill] sm:$0xff] %v2141_v42  ;;  %2742 = vst [vmem:[#allocation16_spill] sm:$0xff] %v2145_v58  ;;  %v2162_v10 = vmul.f32 %v2101_v18, %v2002_v33  ;;  %v866_v28 = vmin.f32 %v863_v2, %v864_v39  ;;  %v2165_v37 = vmul.f32 %v2101_v18, %v1455_v62 }
 0x14d   : > { %2743 = vst [vmem:[#allocation17_spill] sm:$0xff] %v2149_v41  ;;  %2744 = vst [vmem:[#allocation18_spill] sm:$0xff] %v2152_v53  ;;  %v2169_v51 = vmul.f32 %v2101_v18, %v2050_v40  ;;  %v2173_v3 = vmul.f32 %v2101_v18, %v2055_v59 }
 0x14e   : > { %2745 = vst [vmem:[#allocation19_spill] sm:$0xff] %v2155_v32  ;;  %2746 = vst [vmem:[#allocation20_spill] sm:$0xff] %v2158_v38  ;;  %v867_v0 = vmin.f32 %v865_v9, %v866_v28 }
 0x14f   : > { %2747 = vst [vmem:[#allocation21_spill] sm:$0xff] %v2162_v10  ;;  %2748 = vst [vmem:[#allocation22_spill] sm:$0xff] %v2165_v37 }
 0x150   : > { %2749 = vst [vmem:[#allocation23_spill] sm:$0xff] %v2169_v51  ;;  %2750 = vst [vmem:[#allocation24_spill] sm:$0xff] %v2173_v3  ;;  %v868_v45 = vrot.slane %v867_v0, 4  ;;  %v2752_v3 = vld [vmem:[#allocation10_spill] sm:$0xff] }
 0x152   : > { %v869_v57 = vmin.f32 %v867_v0, %v868_v45 }
 0x154   : > { %v870_v48 = vrot.slane %v869_v57, 2 }
 0x156   : > { %v871_v36 = vmin.f32 %v869_v57, %v870_v48 }
 0x158   : > { %v872_v50 = vrot.slane %v871_v36, 1 }
 0x15a   : > { %v2175_v33 = vmin.f32 %v871_v36, %v872_v50  ;;  %v2751_v36 = vld [vmem:[#allocation9_spill] sm:$0xff] }
 0x15c   : > { %vm874_vm4 = vcmp.eq.f32.partialorder %v2072_v25, %v2175_v33  ;;  %vm875_vm5 = vcmp.eq.f32.partialorder %v2075_v61, %v2175_v33  ;;  %vm876_vm6 = vcmp.eq.f32.partialorder %v2021_v49, %v2175_v33  ;;  %vm877_vm7 = vcmp.eq.f32.partialorder %v2078_v19, %v2175_v33 }
 0x15d   : > { %vm878_vm8 = vcmp.eq.f32.partialorder %v2081_v30, %v2175_v33  ;;  %vm879_vm9 = vcmp.eq.f32.partialorder %v2084_v29, %v2175_v33  ;;  %vm880_vm10 = vcmp.eq.f32.partialorder %v2024_v6, %v2175_v33  ;;  %vm881_vm11 = vcmp.eq.f32.partialorder %v2087_v46, %v2175_v33 }
 0x15e   : > { %vm882_vm12 = vcmp.eq.f32.partialorder %v2090_v34, %v2175_v33  ;;  %vm883_vm13 = vcmp.eq.f32.partialorder %v2093_v14, %v2175_v33  ;;  %vm884_vm14 = vcmp.eq.f32.partialorder %v2027_v63, %v2175_v33  ;;  %vm885_vm15 = vcmp.eq.f32.partialorder %v2104_v27, %v2175_v33 }
 0x15f   : > { %vm886_vm0 = vcmp.eq.f32.partialorder %v2107_v26, %v2175_v33  ;;  %vm887_vm1 = vcmp.eq.f32.partialorder %v2110_v52, %v2175_v33  ;;  %vm888_vm2 = vcmp.eq.f32.partialorder %v2030_v60, %v2175_v33  ;;  %vm889_vm3 = vcmp.eq.f32.partialorder %v2113_v44, %v2175_v33 }
 0x160   : > { %v890_v40 = vsel %vm874_vm4, %v1691_v23, 128  ;;  %v891_v59 = vsel %vm875_vm5, %v1850_v24, 128  ;;  %v892_v62 = vsel %vm876_vm6, %v1853_v7, 128  ;;  %v893_v2 = vsel %vm877_vm7, %v1856_v35, 128 }
 0x161   : > { %v894_v55 = vsel %vm878_vm8, %v1859_v8, 128  ;;  %v895_v1 = vsel %vm879_vm9, %v1862_v11, 128  ;;  %v896_v43 = vsel %vm880_vm10, %v1865_v12, 128  ;;  %v897_v39 = vsel %vm881_vm11, %v1868_v5, 128 }
 0x162   : > { %v898_v9 = vsel %vm882_vm12, %v1871_v13, 128  ;;  %v899_v28 = vsel %vm883_vm13, %v1874_v15, 128  ;;  %v900_v0 = vsel %vm884_vm14, %v1877_v16, 128  ;;  %v901_v45 = vsel %vm885_vm15, %v1880_v20, 128 }
 0x163   : > { %v902_v57 = vsel %vm886_vm0, %v1885_v21, 128  ;;  %v903_v48 = vsel %vm887_vm1, %v1888_v22, 128  ;;  %v904_v50 = vsel %vm888_vm2, %v2751_v36, 128  ;;  %v905_v51 = vsel %vm889_vm3, %v2752_v3, 128 }
 0x164   : > { %vm906_vm4 = vcmp.lt.s32.totalorder %v890_v40, %v894_v55  ;;  %vm908_vm5 = vcmp.lt.s32.totalorder %v891_v59, %v895_v1  ;;  %vm910_vm6 = vcmp.lt.s32.totalorder %v892_v62, %v896_v43  ;;  %vm912_vm7 = vcmp.lt.s32.totalorder %v893_v2, %v897_v39 }
 0x165   : > { %v907_v37 = vsel %vm906_vm4, %v890_v40, %v894_v55  ;;  %v909_v10 = vsel %vm908_vm5, %v891_v59, %v895_v1  ;;  %v911_v38 = vsel %vm910_vm6, %v892_v62, %v896_v43  ;;  %v913_v32 = vsel %vm912_vm7, %v893_v2, %v897_v39 }
 0x166   : > { %vm914_vm8 = vcmp.lt.s32.totalorder %v907_v37, %v898_v9  ;;  %vm916_vm9 = vcmp.lt.s32.totalorder %v909_v10, %v899_v28  ;;  %vm918_vm10 = vcmp.lt.s32.totalorder %v911_v38, %v900_v0  ;;  %vm920_vm11 = vcmp.lt.s32.totalorder %v913_v32, %v901_v45 }
 0x167   : > { %v915_v53 = vsel %vm914_vm8, %v907_v37, %v898_v9  ;;  %v917_v41 = vsel %vm916_vm9, %v909_v10, %v899_v28  ;;  %v919_v58 = vsel %vm918_vm10, %v911_v38, %v900_v0  ;;  %v921_v42 = vsel %vm920_vm11, %v913_v32, %v901_v45 }
 0x168   : > { %vm922_vm12 = vcmp.lt.s32.totalorder %v915_v53, %v902_v57  ;;  %vm924_vm13 = vcmp.lt.s32.totalorder %v917_v41, %v903_v48  ;;  %vm926_vm14 = vcmp.lt.s32.totalorder %v919_v58, %v904_v50  ;;  %vm928_vm15 = vcmp.lt.s32.totalorder %v921_v42, %v905_v51 }
 0x169   : > { %v923_v17 = vsel %vm922_vm12, %v915_v53, %v902_v57  ;;  %v925_v56 = vsel %vm924_vm13, %v917_v41, %v903_v48  ;;  %v927_v54 = vsel %vm926_vm14, %v919_v58, %v904_v50  ;;  %v929_v4 = vsel %vm928_vm15, %v921_v42, %v905_v51 }
 0x16a   : > { %vm930_vm0 = vcmp.lt.s32.totalorder %v923_v17, %v925_v56  ;;  %vm932_vm1 = vcmp.lt.s32.totalorder %v927_v54, %v929_v4  ;;  %1584 = vrsqrt.f32 %v2175_v33  ;;  %v998_v41 = vand.u32 2147483648, %v2175_v33 }
 0x16b   : > { %v931_v40 = vsel %vm930_vm0, %v923_v17, %v925_v56  ;;  %v933_v59 = vsel %vm932_vm1, %v927_v54, %v929_v4  ;;  %v2753_v4 = vmov 0.0  }
 0x16c   : > { %vm934_vm2 = vcmp.lt.s32.totalorder %v931_v40, %v933_v59 }
 0x16d   : > { %v935_v62 = vsel %vm934_vm2, %v931_v40, %v933_v59 }
 0x16e   : > { %v936_v37 = vrot.slane %v935_v62, 4 }
 0x170   : > { %vm937_vm3 = vcmp.lt.s32.totalorder %v935_v62, %v936_v37 }
 0x171   : > { %v938_v38 = vsel %vm937_vm3, %v935_v62, %v936_v37 }
 0x172   : > { %v939_v32 = vrot.slane %v938_v38, 2 }
 0x174   : > { %vm940_vm4 = vcmp.lt.s32.totalorder %v938_v38, %v939_v32 }
 0x175   : > { %v941_v10 = vsel %vm940_vm4, %v938_v38, %v939_v32 }
 0x176   : > { %v942_v2 = vrot.slane %v941_v10, 1 }
 0x177   : > { %v1585_v55 = vpop.eup %1584 }
 0x178   : > { %vm943_vm5 = vcmp.lt.s32.totalorder %v941_v10, %v942_v2  ;;  %v994_v58 = vmul.f32 %v1585_v55, %v2175_v33 }
 0x179   : > { %v944_v42 = vsel %vm943_vm5, %v941_v10, %v942_v2 }
 0x17a   : > { %vm945_vm7 = vcmp.eq.s32.totalorder %v1691_v23, %v944_v42  ;;  %vm946_vm8 = vcmp.eq.s32.totalorder %v1850_v24, %v944_v42  ;;  %vm947_vm9 = vcmp.eq.s32.totalorder %v1853_v7, %v944_v42  ;;  %vm948_vm10 = vcmp.eq.s32.totalorder %v1856_v35, %v944_v42 }
 0x17b   : > { %vm949_vm12 = vcmp.eq.s32.totalorder %v1859_v8, %v944_v42  ;;  %vm950_vm13 = vcmp.eq.s32.totalorder %v1862_v11, %v944_v42  ;;  %vm951_vm14 = vcmp.eq.s32.totalorder %v1865_v12, %v944_v42  ;;  %vm952_vm15 = vcmp.eq.s32.totalorder %v1868_v5, %v944_v42 }
 0x17c   : > { %vm953_vm0 = vcmp.eq.s32.totalorder %v1871_v13, %v944_v42  ;;  %vm954_vm1 = vcmp.eq.s32.totalorder %v1874_v15, %v944_v42  ;;  %vm955_vm2 = vcmp.eq.s32.totalorder %v1877_v16, %v944_v42  ;;  %vm956_vm3 = vcmp.eq.s32.totalorder %v1880_v20, %v944_v42 }
 0x17d   : > { %vm957_vm4 = vcmp.eq.s32.totalorder %v1885_v21, %v944_v42  ;;  %vm958_vm5 = vcmp.eq.s32.totalorder %v1888_v22, %v944_v42  ;;  %vm959_vm11 = vcmp.eq.s32.totalorder %v2751_v36, %v944_v42  ;;  %vm960_vm6 = vcmp.eq.s32.totalorder %v2752_v3, %v944_v42 }
 0x17e   : > { %v2297_v54 = vsel %vm945_vm7, 1.0, %v2753_v4  ;;  %v2302_v56 = vsel %vm946_vm8, 1.0, %v2753_v4  ;;  %v2307_v17 = vsel %vm947_vm9, 1.0, %v2753_v4  ;;  %v2312_v53 = vsel %vm948_vm10, 1.0, %v2753_v4 }
 0x17f   : > { %v2317_v51 = vsel %vm949_vm12, 1.0, %v2753_v4  ;;  %v2322_v1 = vsel %vm950_vm13, 1.0, %v2753_v4  ;;  %v2327_v43 = vsel %vm951_vm14, 1.0, %v2753_v4  ;;  %v2332_v39 = vsel %vm952_vm15, 1.0, %v2753_v4 }
 0x180   : > { %v2337_v9 = vsel %vm953_vm0, 1.0, %v2753_v4  ;;  %v2342_v28 = vsel %vm954_vm1, 1.0, %v2753_v4  ;;  %v2347_v0 = vsel %vm955_vm2, 1.0, %v2753_v4  ;;  %v2352_v45 = vsel %vm956_vm3, 1.0, %v2753_v4 }
 0x181   : > { %v2357_v57 = vsel %vm957_vm4, 1.0, %v2753_v4  ;;  %v2362_v48 = vsel %vm958_vm5, 1.0, %v2753_v4  ;;  %v1482_v50 = vsel %vm959_vm11, 1.0, %v2753_v4  ;;  %v1483_v40 = vsel %vm960_vm6, 1.0, %v2753_v4 }
 0x182   : > { %vm2754_vm7 = vcmp.eq.f32.partialorder %v2175_v33, inf  ;;  %v1036_v62 = vmul.f32 1e+30, %v2297_v54  ;;  %v1037_v37 = vmul.f32 1e+30, %v2302_v56  ;;  %vm2755_vm8 = vcmp.eq.f32.partialorder %v2175_v33, 0.0 }
 0x183   : > { %v996_v59 = vsel %vm2754_vm7, %v2175_v33, %v994_v58  ;;  %v1038_v38 = vmul.f32 1e+30, %v2307_v17  ;;  %v1039_v10 = vmul.f32 1e+30, %v2312_v53  ;;  %v1040_v2 = vmul.f32 1e+30, %v2317_v51 }
 0x184   : > { %v999_v32 = vsel %vm2755_vm8, %v998_v41, %v996_v59  ;;  %v1041_v55 = vmul.f32 1e+30, %v2322_v1  ;;  %v1042_v3 = vmul.f32 1e+30, %v2327_v43  ;;  %v1043_v58 = vmul.f32 1e+30, %v2332_v39 }
 0x185   : > { %v1000_v42 = vadd.f32 1e-08, %v999_v32  ;;  %v2385_v36 = vadd.f32 %v1036_v62, %v2072_v25  ;;  %v1044_v22 = vmul.f32 1e+30, %v2337_v9  ;;  %v1045_v33 = vmul.f32 1e+30, %v2342_v28 }
 0x186   : > { %v1046_v41 = vmul.f32 1e+30, %v2347_v0  ;;  %v2391_v59 = vadd.f32 %v1037_v37, %v2075_v61  ;;  %v1047_v21 = vmul.f32 1e+30, %v2352_v45  ;;  %v1048_v32 = vmul.f32 1e+30, %v2357_v57 }
 0x187   : > { %1586 = vrcp.f32 %v1000_v42  ;;  %v1049_v20 = vmul.f32 1e+30, %v2362_v48  ;;  %v1050_v25 = vmul.f32 1e+30, %v1482_v50  ;;  %v1051_v62 = vmul.f32 1e+30, %v1483_v40 }
 0x188   : > { %v2404_v16 = vadd.f32 %v1038_v38, %v2021_v49  ;;  %v2407_v61 = vadd.f32 %v1039_v10, %v2078_v19  ;;  %v2410_v37 = vadd.f32 %v1040_v2, %v2081_v30  ;;  %v2413_v42 = vadd.f32 %v1041_v55, %v2084_v29 }
 0x189   : > { %v2416_v15 = vadd.f32 %v1042_v3, %v2024_v6  ;;  %v2419_v13 = vadd.f32 %v1043_v58, %v2087_v46  ;;  %v2422_v5 = vadd.f32 %v1044_v22, %v2090_v34  ;;  %v2425_v49 = vadd.f32 %v1045_v33, %v2093_v14 }
 0x18a   : > { %v2428_v19 = vadd.f32 %v1046_v41, %v2027_v63  ;;  %v2431_v30 = vadd.f32 %v1047_v21, %v2104_v27  ;;  %v2434_v29 = vadd.f32 %v1048_v32, %v2107_v26  ;;  %v2437_v6 = vadd.f32 %v1049_v20, %v2110_v52 }
 0x18b   : > { %v2440_v46 = vadd.f32 %v1050_v25, %v2030_v60  ;;  %v2443_v22 = vadd.f32 %v1051_v62, %v2113_v44  ;;  %v1068_v34 = vmin.f32 %v2385_v36, %v2410_v37  ;;  %v1069_v63 = vmin.f32 %v2391_v59, %v2413_v42 }
 0x18c   : > { %v1070_v21 = vmin.f32 %v2404_v16, %v2416_v15  ;;  %v1071_v14 = vmin.f32 %v2407_v61, %v2419_v13  ;;  %vm1622_vm6 = vmmov 0  }
 0x18d   : > { %v1072_v20 = vmin.f32 %v1068_v34, %v2422_v5  ;;  %v1073_v60 = vmin.f32 %v1069_v63, %v2425_v49  ;;  %1535 = vmatprep.mubr.msk.bf16.mxu0 %vm1622_vm6, %v2753_v4 }
 0x18e   : > { %v1074_v27 = vmin.f32 %v1070_v21, %v2428_v19  ;;  %v1075_v26 = vmin.f32 %v1071_v14, %v2431_v30 }
 0x18f   : > { %v1076_v52 = vmin.f32 %v1072_v20, %v2434_v29  ;;  %v1077_v44 = vmin.f32 %v1073_v60, %v2437_v6 }
 0x190   : > { %v1078_v3 = vmin.f32 %v1074_v27, %v2440_v46  ;;  %v1079_v38 = vmin.f32 %v1075_v26, %v2443_v22 }
 0x191   : > { %v1080_v10 = vmin.f32 %v1076_v52, %v1077_v44  ;;  %v2760_v52 = vld [vmem:[#allocation15_spill] sm:$0xff] }
 0x192   : > { %v1081_v2 = vmin.f32 %v1078_v3, %v1079_v38 }
 0x194   : > { %v1587_v55 = vpop.eup %1586  ;;  %v1082_v58 = vmin.f32 %v1080_v10, %v1081_v2 }
 0x195   : > { %v1017_v33 = vmul.f32 %v1587_v55, %v1482_v50  ;;  %v1018_v41 = vmul.f32 %v1587_v55, %v1483_v40  ;;  %v2463_v32 = vadd.f32 %v1587_v55, %v2101_v18  ;;  %v1015_v25 = vmul.f32 %v1587_v55, %v2357_v57  ;;  %v2756_v50 = vld [vmem:[#allocation11_spill] sm:$0xff]  ;;  %v2757_v57 = vld [vmem:[#allocation12_spill] sm:$0xff] }
 0x196   : > { %v1083_v62 = vrot.slane %v1082_v58, 4  ;;  %v1016_v34 = vmul.f32 %v1587_v55, %v2362_v48  ;;  %v1013_v63 = vmul.f32 %v1587_v55, %v2347_v0  ;;  %v1014_v21 = vmul.f32 %v1587_v55, %v2352_v45  ;;  %v2758_v48 = vld [vmem:[#allocation13_spill] sm:$0xff]  ;;  %v2759_v0 = vld [vmem:[#allocation14_spill] sm:$0xff] }
 0x197   : > { %v2470_v14 = vadd.f32 %v1017_v33, %v2117_v47  ;;  %v2473_v20 = vadd.f32 %v1018_v41, %v2120_v31  ;;  %v2476_v40 = vadd.f32 %v1015_v25, %v2756_v50  ;;  %v1011_v18 = vmul.f32 %v1587_v55, %v2337_v9  ;;  %v2762_v41 = vld [vmem:[#allocation17_spill] sm:$0xff]  ;;  %v2767_v50 = vld [vmem:[#allocation22_spill] sm:$0xff] }
 0x198   : > { %v1084_v60 = vmin.f32 %v1082_v58, %v1083_v62  ;;  %v2480_v27 = vadd.f32 %v1016_v34, %v2757_v57  ;;  %v2483_v26 = vadd.f32 %v1013_v63, %v2758_v48  ;;  %v2486_v45 = vadd.f32 %v1014_v21, %v2759_v0  ;;  %v2761_v58 = vld [vmem:[#allocation16_spill] sm:$0xff] }
 0x199   : > { %v1012_v47 = vmul.f32 %v1587_v55, %v2342_v28  ;;  %v2490_v31 = vadd.f32 %v1011_v18, %v2760_v52  ;;  %v1009_v44 = vmul.f32 %v1587_v55, %v2327_v43  ;;  %v1010_v3 = vmul.f32 %v1587_v55, %v2332_v39  ;;  %v2763_v28 = vld [vmem:[#allocation18_spill] sm:$0xff]  ;;  %v2764_v39 = vld [vmem:[#allocation19_spill] sm:$0xff] }
 0x19a   : > { %v1085_v9 = vrot.slane %v1084_v60, 2  ;;  %v1007_v38 = vmul.f32 %v1587_v55, %v2317_v51  ;;  %v1008_v10 = vmul.f32 %v1587_v55, %v2322_v1  ;;  %v1005_v2 = vmul.f32 %v1587_v55, %v2307_v17  ;;  %v2765_v51 = vld [vmem:[#allocation20_spill] sm:$0xff]  ;;  %v2766_v1 = vld [vmem:[#allocation21_spill] sm:$0xff] }
 0x19b   : > { %v2498_v33 = vadd.f32 %v1012_v47, %v2761_v58  ;;  %v2501_v25 = vadd.f32 %v1009_v44, %v2762_v41  ;;  %v2504_v62 = vadd.f32 %v1010_v3, %v2763_v28  ;;  %v1006_v43 = vmul.f32 %v1587_v55, %v2312_v53  ;;  %v2768_v47 = vld [vmem:[#allocation23_spill] sm:$0xff]  ;;  %v2774_v58 = vld [vmem:[#allocation6_spill] sm:$0xff]  ;;  %v2776_v28 = vld [vmem:[#allocation8_spill] sm:$0xff] }
 0x19c   : > { %v1086_v34 = vmin.f32 %v1084_v60, %v1085_v9  ;;  %v2508_v63 = vadd.f32 %v1007_v38, %v2764_v39  ;;  %v2511_v21 = vadd.f32 %v1008_v10, %v2765_v51  ;;  %v2514_v17 = vadd.f32 %v1005_v2, %v2766_v1  ;;  %v2769_v60 = vld [vmem:[#allocation24_spill] sm:$0xff]  ;;  %v2770_v9 = vld [vmem:[#allocation2_spill] sm:$0xff]  ;;  %v2771_v38 = vld [vmem:[#allocation3_spill] sm:$0xff] }
 0x19d   : > { %v2517_v18 = vadd.f32 %v1006_v43, %v2767_v50  ;;  %v1003_v57 = vmul.f32 %v1587_v55, %v2297_v54  ;;  %v1004_v48 = vmul.f32 %v1587_v55, %v2302_v56  ;;  %v2772_v10 = vld [vmem:[#allocation4_spill] sm:$0xff]  ;;  %v2773_v2 = vld [vmem:[#allocation5_spill] sm:$0xff]  ;;  %v2775_v41 = vld [vmem:[#allocation7_spill] sm:$0xff] }
 0x19e   : > { %v1087_v0 = vrot.slane %v1086_v34, 1  ;;  %v2777_v43 = vld [vmem:[#allocation9_spill] sm:$0xff] }
 0x19f   : > { %v2522_v53 = vadd.f32 %v1003_v57, %v2768_v47  ;;  %v2525_v52 = vadd.f32 %v1004_v48, %v2769_v60 }
 0x1a0   : > { %v2527_v44 = vmin.f32 %v1086_v34, %v1087_v0  ;;  %v2778_v34 = vld [vmem:[#allocation10_spill] sm:$0xff] }
 0x1a2   : > { %vm1089_vm9 = vcmp.eq.f32.partialorder %v2385_v36, %v2527_v44  ;;  %vm1090_vm10 = vcmp.eq.f32.partialorder %v2391_v59, %v2527_v44  ;;  %vm1091_vm11 = vcmp.eq.f32.partialorder %v2404_v16, %v2527_v44  ;;  %vm1092_vm12 = vcmp.eq.f32.partialorder %v2407_v61, %v2527_v44 }
 0x1a3   : > { %vm1093_vm13 = vcmp.eq.f32.partialorder %v2410_v37, %v2527_v44  ;;  %vm1094_vm14 = vcmp.eq.f32.partialorder %v2413_v42, %v2527_v44  ;;  %vm1095_vm15 = vcmp.eq.f32.partialorder %v2416_v15, %v2527_v44  ;;  %vm1096_vm0 = vcmp.eq.f32.partialorder %v2419_v13, %v2527_v44 }
 0x1a4   : > { %vm1097_vm1 = vcmp.eq.f32.partialorder %v2422_v5, %v2527_v44  ;;  %vm1098_vm2 = vcmp.eq.f32.partialorder %v2425_v49, %v2527_v44  ;;  %vm1099_vm3 = vcmp.eq.f32.partialorder %v2428_v19, %v2527_v44  ;;  %vm1100_vm4 = vcmp.eq.f32.partialorder %v2431_v30, %v2527_v44 }
 0x1a5   : > { %vm1101_vm5 = vcmp.eq.f32.partialorder %v2434_v29, %v2527_v44  ;;  %vm1102_vm7 = vcmp.eq.f32.partialorder %v2437_v6, %v2527_v44  ;;  %vm1103_vm8 = vcmp.eq.f32.partialorder %v2440_v46, %v2527_v44  ;;  %vm1104_vm6 = vcmp.eq.f32.partialorder %v2443_v22, %v2527_v44 }
 0x1a6   : > { %v1105_v54 = vsel %vm1089_vm9, %v1691_v23, 128  ;;  %v1106_v56 = vsel %vm1090_vm10, %v1850_v24, 128  ;;  %v1107_v55 = vsel %vm1091_vm11, %v1853_v7, 128  ;;  %v1108_v3 = vsel %vm1092_vm12, %v1856_v35, 128 }
 0x1a7   : > { %v1109_v36 = vsel %vm1093_vm13, %v1859_v8, 128  ;;  %v1110_v59 = vsel %vm1094_vm14, %v1862_v11, 128  ;;  %v1111_v16 = vsel %vm1095_vm15, %v1865_v12, 128  ;;  %v1112_v61 = vsel %vm1096_vm0, %v2770_v9, 128 }
 0x1a8   : > { %v1113_v37 = vsel %vm1097_vm1, %v2771_v38, 128  ;;  %v1114_v42 = vsel %vm1098_vm2, %v2772_v10, 128  ;;  %v1115_v15 = vsel %vm1099_vm3, %v2773_v2, 128  ;;  %v1116_v13 = vsel %vm1100_vm4, %v2774_v58, 128 }
 0x1a9   : > { %v1117_v5 = vsel %vm1101_vm5, %v2775_v41, 128  ;;  %v1118_v49 = vsel %vm1102_vm7, %v2776_v28, 128  ;;  %v1119_v19 = vsel %vm1103_vm8, %v2777_v43, 128  ;;  %v1120_v30 = vsel %vm1104_vm6, %v2778_v34, 128 }
 0x1aa   : > { %vm1121_vm9 = vcmp.lt.s32.totalorder %v1105_v54, %v1109_v36  ;;  %vm1123_vm10 = vcmp.lt.s32.totalorder %v1106_v56, %v1110_v59  ;;  %vm1125_vm11 = vcmp.lt.s32.totalorder %v1107_v55, %v1111_v16  ;;  %vm1127_vm12 = vcmp.lt.s32.totalorder %v1108_v3, %v1112_v61 }
 0x1ab   : > { %v1122_v29 = vsel %vm1121_vm9, %v1105_v54, %v1109_v36  ;;  %v1124_v39 = vsel %vm1123_vm10, %v1106_v56, %v1110_v59  ;;  %v1126_v51 = vsel %vm1125_vm11, %v1107_v55, %v1111_v16  ;;  %v1128_v1 = vsel %vm1127_vm12, %v1108_v3, %v1112_v61 }
 0x1ac   : > { %vm1129_vm13 = vcmp.lt.s32.totalorder %v1122_v29, %v1113_v37  ;;  %vm1131_vm14 = vcmp.lt.s32.totalorder %v1124_v39, %v1114_v42  ;;  %vm1133_vm15 = vcmp.lt.s32.totalorder %v1126_v51, %v1115_v15  ;;  %vm1135_vm0 = vcmp.lt.s32.totalorder %v1128_v1, %v1116_v13 }
 0x1ad   : > { %v1130_v6 = vsel %vm1129_vm13, %v1122_v29, %v1113_v37  ;;  %v1132_v46 = vsel %vm1131_vm14, %v1124_v39, %v1114_v42  ;;  %v1134_v50 = vsel %vm1133_vm15, %v1126_v51, %v1115_v15  ;;  %v1136_v57 = vsel %vm1135_vm0, %v1128_v1, %v1116_v13 }
 0x1ae   : > { %vm1137_vm1 = vcmp.lt.s32.totalorder %v1130_v6, %v1117_v5  ;;  %vm1139_vm2 = vcmp.lt.s32.totalorder %v1132_v46, %v1118_v49  ;;  %vm1141_vm3 = vcmp.lt.s32.totalorder %v1134_v50, %v1119_v19  ;;  %vm1143_vm4 = vcmp.lt.s32.totalorder %v1136_v57, %v1120_v30 }
 0x1af   : > { %v1138_v22 = vsel %vm1137_vm1, %v1130_v6, %v1117_v5  ;;  %v1140_v48 = vsel %vm1139_vm2, %v1132_v46, %v1118_v49  ;;  %v1142_v0 = vsel %vm1141_vm3, %v1134_v50, %v1119_v19  ;;  %v1144_v47 = vsel %vm1143_vm4, %v1136_v57, %v1120_v30 }
 0x1b0   : > { %vm1145_vm5 = vcmp.lt.s32.totalorder %v1138_v22, %v1140_v48  ;;  %vm1147_vm7 = vcmp.lt.s32.totalorder %v1142_v0, %v1144_v47  ;;  %1588 = vrsqrt.f32 %v2527_v44  ;;  %vm1210_vm10 = vcmp.eq.f32.partialorder %v2527_v44, inf }
 0x1b1   : > { %v1146_v60 = vsel %vm1145_vm5, %v1138_v22, %v1140_v48  ;;  %v1148_v54 = vsel %vm1147_vm7, %v1142_v0, %v1144_v47  ;;  %v1213_v42 = vand.u32 2147483648, %v2527_v44  ;;  %vm1212_vm11 = vcmp.eq.f32.partialorder %v2527_v44, 0.0 }
 0x1b2   : > { %vm1149_vm8 = vcmp.lt.s32.totalorder %v1146_v60, %v1148_v54 }
 0x1b3   : > { %v1150_v56 = vsel %vm1149_vm8, %v1146_v60, %v1148_v54 }
 0x1b4   : > { %v1151_v55 = vrot.slane %v1150_v56, 4 }
 0x1b6   : > { %vm1152_vm6 = vcmp.lt.s32.totalorder %v1150_v56, %v1151_v55 }
 0x1b7   : > { %v1153_v3 = vsel %vm1152_vm6, %v1150_v56, %v1151_v55 }
 0x1b8   : > { %v1154_v36 = vrot.slane %v1153_v3, 2 }
 0x1ba   : > { %vm1155_vm9 = vcmp.lt.s32.totalorder %v1153_v3, %v1154_v36 }
 0x1bb   : > { %v1156_v59 = vsel %vm1155_vm9, %v1153_v3, %v1154_v36 }
 0x1bc   : > { %v1157_v61 = vrot.slane %v1156_v59, 1 }
 0x1bd   : > { %v1589_v16 = vpop.eup %1588 }
 0x1be   : > { %v1209_v37 = vmul.f32 %v1589_v16, %v2527_v44  ;;  %vm1158_vm12 = vcmp.lt.s32.totalorder %v1156_v59, %v1157_v61 }
 0x1bf   : > { %v1159_v49 = vsel %vm1158_vm12, %v1156_v59, %v1157_v61 }
 0x1c0   : > { %v1211_v15 = vsel %vm1210_vm10, %v2527_v44, %v1209_v37  ;;  %vm1174_vm13 = vcmp.eq.s32.totalorder %v2777_v43, %v1159_v49  ;;  %vm1175_vm14 = vcmp.eq.s32.totalorder %v2778_v34, %v1159_v49  ;;  %vm1172_vm15 = vcmp.eq.s32.totalorder %v2775_v41, %v1159_v49 }
 0x1c1   : > { %v1214_v13 = vsel %vm1212_vm11, %v1213_v42, %v1211_v15  ;;  %vm1173_vm0 = vcmp.eq.s32.totalorder %v2776_v28, %v1159_v49  ;;  %v1498_v19 = vsel %vm1174_vm13, 1.0, %v2753_v4  ;;  %v1499_v30 = vsel %vm1175_vm14, 1.0, %v2753_v4 }
 0x1c2   : > { %v1215_v5 = vadd.f32 1e-08, %v1214_v13  ;;  %v1496_v29 = vsel %vm1172_vm15, 1.0, %v2753_v4  ;;  %v1497_v44 = vsel %vm1173_vm0, 1.0, %v2753_v4  ;;  %vm1170_vm1 = vcmp.eq.s32.totalorder %v2773_v2, %v1159_v49 }
 0x1c3   : > { %vm1171_vm2 = vcmp.eq.s32.totalorder %v2774_v58, %v1159_v49  ;;  %vm1168_vm3 = vcmp.eq.s32.totalorder %v2771_v38, %v1159_v49  ;;  %vm1169_vm4 = vcmp.eq.s32.totalorder %v2772_v10, %v1159_v49  ;;  %vm1166_vm5 = vcmp.eq.s32.totalorder %v1865_v12, %v1159_v49 }
 0x1c4   : > { %1590 = vrcp.f32 %v1215_v5  ;;  %vm1167_vm7 = vcmp.eq.s32.totalorder %v2770_v9, %v1159_v49  ;;  %vm1164_vm8 = vcmp.eq.s32.totalorder %v1859_v8, %v1159_v49  ;;  %vm1165_vm6 = vcmp.eq.s32.totalorder %v1862_v11, %v1159_v49 }
 0x1c5   : > { %vm1162_vm9 = vcmp.eq.s32.totalorder %v1853_v7, %v1159_v49  ;;  %vm1163_vm10 = vcmp.eq.s32.totalorder %v1856_v35, %v1159_v49  ;;  %vm1160_vm11 = vcmp.eq.s32.totalorder %v1691_v23, %v1159_v49  ;;  %vm1161_vm12 = vcmp.eq.s32.totalorder %v1850_v24, %v1159_v49 }
 0x1c6   : > { %v1494_v38 = vsel %vm1170_vm1, 1.0, %v2753_v4  ;;  %v1495_v10 = vsel %vm1171_vm2, 1.0, %v2753_v4  ;;  %v1492_v12 = vsel %vm1168_vm3, 1.0, %v2753_v4  ;;  %v1493_v9 = vsel %vm1169_vm4, 1.0, %v2753_v4 }
 0x1c7   : > { %v1490_v8 = vsel %vm1166_vm5, 1.0, %v2753_v4  ;;  %v1491_v11 = vsel %vm1167_vm7, 1.0, %v2753_v4  ;;  %v1488_v7 = vsel %vm1164_vm8, 1.0, %v2753_v4  ;;  %v1489_v35 = vsel %vm1165_vm6, 1.0, %v2753_v4 }
 0x1c8   : > { %v1486_v23 = vsel %vm1162_vm9, 1.0, %v2753_v4  ;;  %v1487_v24 = vsel %vm1163_vm10, 1.0, %v2753_v4  ;;  %v1484_v58 = vsel %vm1160_vm11, 1.0, %v2753_v4  ;;  %v1485_v41 = vsel %vm1161_vm12, 1.0, %v2753_v4 }
 0x1d1   : > { %v1591_v2 = vpop.eup %1590 }
 0x1d2   : > { %v1232_v28 = vmul.f32 %v1591_v2, %v1498_v19  ;;  %v1233_v43 = vmul.f32 %v1591_v2, %v1499_v30  ;;  %v1250_v34 = vadd.f32 %v1591_v2, %v2463_v32  ;;  %v1230_v39 = vmul.f32 %v1591_v2, %v1496_v29 }
 0x1d3   : > { %v1231_v51 = vmul.f32 %v1591_v2, %v1497_v44  ;;  %v1228_v1 = vmul.f32 %v1591_v2, %v1494_v38  ;;  %v1229_v6 = vmul.f32 %v1591_v2, %v1495_v10  ;;  %v1226_v46 = vmul.f32 %v1591_v2, %v1492_v12 }
 0x1d4   : > { %v1248_v50 = vadd.f32 %v1232_v28, %v2470_v14  ;;  %v1249_v57 = vadd.f32 %v1233_v43, %v2473_v20  ;;  %1592 = vrcp.f32 %v1250_v34  ;;  %v1246_v22 = vadd.f32 %v1230_v39, %v2476_v40 }
 0x1d5   : > { %v1247_v48 = vadd.f32 %v1231_v51, %v2480_v27  ;;  %v1244_v0 = vadd.f32 %v1228_v1, %v2483_v26  ;;  %v1245_v47 = vadd.f32 %v1229_v6, %v2486_v45  ;;  %v1227_v60 = vmul.f32 %v1591_v2, %v1493_v9 }
 0x1d6   : > { %v1242_v32 = vadd.f32 %v1226_v46, %v2490_v31  ;;  %v1224_v54 = vmul.f32 %v1591_v2, %v1490_v8  ;;  %v1225_v56 = vmul.f32 %v1591_v2, %v1491_v11  ;;  %v1222_v55 = vmul.f32 %v1591_v2, %v1488_v7 }
 0x1d7   : > { %v1243_v3 = vadd.f32 %v1227_v60, %v2498_v33  ;;  %v1223_v14 = vmul.f32 %v1591_v2, %v1489_v35  ;;  %v1220_v36 = vmul.f32 %v1591_v2, %v1486_v23  ;;  %v1221_v20 = vmul.f32 %v1591_v2, %v1487_v24 }
 0x1d8   : > { %v1240_v59 = vadd.f32 %v1224_v54, %v2501_v25  ;;  %v1241_v40 = vadd.f32 %v1225_v56, %v2504_v62  ;;  %v1238_v27 = vadd.f32 %v1222_v55, %v2508_v63  ;;  %v1218_v26 = vmul.f32 %v1591_v2, %v1484_v58 }
 0x1d9   : > { %v1239_v45 = vadd.f32 %v1223_v14, %v2511_v21  ;;  %v1236_v16 = vadd.f32 %v1220_v36, %v2514_v17  ;;  %v1237_v31 = vadd.f32 %v1221_v20, %v2517_v18  ;;  %v1219_v61 = vmul.f32 %v1591_v2, %v1485_v41  ;;  %v1579_v2 = vld [vmem:[%s2401_s27] sm:$0x1f]  }
 0x1da   : > { %v1234_v37 = vadd.f32 %v1218_v26, %v2522_v53 }
 0x1db   : > { %v1235_v33 = vadd.f32 %v1219_v61, %v2525_v52 }
 0x1e1   : > { %v1593_v42 = vpop.eup %1592 }
 0x1e2   : > { %v1267_v15 = vmul.f32 %v1593_v42, %v1248_v50  ;;  %v1268_v13 = vmul.f32 %v1593_v42, %v1249_v57  ;;  %v1265_v25 = vmul.f32 %v1593_v42, %v1246_v22  ;;  %v1266_v5 = vmul.f32 %v1593_v42, %v1247_v48 }
 0x1e3   : > { %v1263_v62 = vmul.f32 %v1593_v42, %v1244_v0  ;;  %v1264_v49 = vmul.f32 %v1593_v42, %v1245_v47  ;;  %v1261_v63 = vmul.f32 %v1593_v42, %v1242_v32  ;;  %v1262_v19 = vmul.f32 %v1593_v42, %v1243_v3 }
 0x1e4   : > { %v1276_v30 = vpack.c.bf16 %v1268_v13, %v1267_v15  ;;  %v1275_v21 = vpack.c.bf16 %v1266_v5, %v1265_v25  ;;  %v1259_v29 = vmul.f32 %v1593_v42, %v1240_v59  ;;  %v1260_v17 = vmul.f32 %v1593_v42, %v1241_v40 }
 0x1e5   : > { %v1274_v44 = vpack.c.bf16 %v1264_v49, %v1263_v62  ;;  %v1273_v18 = vpack.c.bf16 %v1262_v19, %v1261_v63  ;;  %v1257_v38 = vmul.f32 %v1593_v42, %v1238_v27  ;;  %v1258_v10 = vmul.f32 %v1593_v42, %v1239_v45 }
 0x1e6   : > { %1520 = vmatpush3.bf16.msra.mxu0 %v1276_v30  ;;  %v1272_v53 = vpack.c.bf16 %v1260_v17, %v1259_v29  ;;  %v1255_v52 = vmul.f32 %v1593_v42, %v1236_v16  ;;  %v1256_v12 = vmul.f32 %v1593_v42, %v1237_v31  ;;  %v1253_v9 = vmul.f32 %v1593_v42, %v1234_v37 }
 0x1e7   : > { %1521 = vmatprep.subr.bf16.mxu0 %v2753_v4  ;;  %v1271_v8 = vpack.c.bf16 %v1258_v10, %v1257_v38  ;;  %v1254_v11 = vmul.f32 %v1593_v42, %v1235_v33 }
 0x1e8   : > { %v1270_v7 = vpack.c.bf16 %v1256_v12, %v1255_v52 }
 0x1e9   : > { %v1269_v35 = vpack.c.bf16 %v1254_v11, %v1253_v9 }
 0x1ea   : > { %1522 = vmatpush3.bf16.msra.mxu0 %v1275_v21 }
 0x1eb   : > { %1523 = vmatprep.subr.bf16.mxu0 %v2753_v4 }
 0x1ee   : > { %1524 = vmatpush3.bf16.msra.mxu0 %v1274_v44 }
 0x1ef   : > { %1525 = vmatprep.subr.bf16.mxu0 %v2753_v4 }
 0x1f2   : > { %1526 = vmatpush3.bf16.msra.mxu0 %v1273_v18 }
 0x1f3   : > { %1527 = vmatprep.subr.bf16.mxu0 %v2753_v4 }
 0x1f6   : > { %1528 = vmatpush3.bf16.msra.mxu0 %v1272_v53 }
 0x1f7   : > { %1529 = vmatprep.subr.bf16.mxu0 %v2753_v4 }
 0x1fa   : > { %1530 = vmatpush3.bf16.msra.mxu0 %v1271_v8 }
 0x1fb   : > { %1531 = vmatprep.subr.bf16.mxu0 %v2753_v4 }
 0x1fe   : > { %1532 = vmatpush3.bf16.msra.mxu0 %v1270_v7 }
 0x1ff   : > { %1533 = vmatprep.subr.bf16.mxu0 %v2753_v4 }
 0x202   : > { %1534 = vmatpush3.bf16.msra.mxu0 %v1269_v35 }
 0x205   : > { %1536 = vmatmul.mubr.bf16.vlgmr.msra.gmra.mxu0 %v1579_v2 }
 0x2c5   : > { %v1319_v23 = vpop.f32.mrf.mxu0 }
 0x2c6   : > { %v1508_v24 = vpack.c.bf16 %v1319_v23, %v1319_v23 }
 0x2c7   : > { %v1537_v58 = vpop.f32.mrf.mxu0 }
 0x2c8   : > { %1334 = vst [vmem:[%s238_s30] sm:$0xf] %v1508_v24 }
 0x2c9   : > { %v1322_v41 = vpop.f32.mrf.mxu0 }
 0x2ca   : > { %v1509_v28 = vpack.c.bf16 %v1322_v41, %v1322_v41 }
 0x2cb   : > { %v1538_v43 = vpop.f32.mrf.mxu0 }
 0x2cc   : > { %1335 = vst [vmem:[%s238_s30 + $0x4] sm:$0x1] %v1509_v28 }
 0x2cd PF: > { %s13_s14 = sadd.s32 1, %s1616_s14   ;;  %s2779_s12 = smov %s1612_s13 }
 0x2ce   : > { %p10_p5 = scmp.ge.s32.totalorder %s13_s14, 4   ;;  %s2780_s13 = smov %s2782_s15 }
 0x2d0   :  { %12 = sbr.rel (!%p10_p5) target bundleno = 2 (0x2), region = 68 }

</bundles_post_ra>
